<compile_context>
chip_gen: v7x
topology: tpu7x:2x2x1
jax: 0.10.0
libtpu: 0.0.40
codegen_flags: <defaults>
</compile_context>

<pallas_src>
import jax
import jax.numpy as jnp
from jax import lax
from jax.experimental import pallas as pl
from jax.experimental.pallas import tpu as pltpu

# -------- model hyperparameters (CGCNNConfig defaults) --------
NUM_CONV = 3
ATOM_IN = 92           # atom_input_features
ATOM_PAD = 128         # atom features zero-padded to an aligned K
EDGE_F = 41            # edge_features (RBF bins)
EDGE_PAD = 64          # RBF features zero-padded to an aligned K
NODE_F = 64            # node_features
GATE_F = 2 * NODE_F    # 128-wide pre-gate message width
FC_F = 128             # fc_features
OUT_F = 1              # output_features
HEAD_PAD = 128         # lane-dense head output width (column 0 is the real output)
RBF_VMIN, RBF_VMAX = 0.0, 8.0
RBF_GAMMA = 1.0 / ((RBF_VMAX - RBF_VMIN) / (EDGE_F - 1))   # = 5.0 (1 / mean center spacing)
BN_EPS = 1e-5


def _softplus(x):
    # numerically stable softplus, matches F.softplus(beta=1)
    return jnp.maximum(x, 0.0) + jnp.log1p(jnp.exp(-jnp.abs(x)))


def _sigmoid(x):
    return 1.0 / (1.0 + jnp.exp(-x))


def cgcnn_kernel(ef_ref, v_ref, S_ref, D_ref, P_ref,
                 Wemb_ref, bemb_ref,
                 Wsd_ref, bsd_ref,
                 Wedge_ref, bedge_ref,
                 gmsg_ref, bmsg_ref, gbn_ref, bbn_ref,
                 Wfc_ref, bfc_ref, Wout_ref, bout_ref,
                 out_ref):
    f32 = jnp.float32
    bf16 = jnp.bfloat16

    ef = ef_ref[...]                      # [E, EDGE_PAD] precomputed RBF features (f32)
    S = S_ref[...]                        # [E, N] src one-hot (bf16, exact 0/1)
    D = D_ref[...]                        # [E, N] dst one-hot (bf16, exact 0/1)
    E = S.shape[0]
    N = S.shape[1]

    ones_e = jnp.ones((1, E), f32)
    ones_n = jnp.ones((1, N), f32)
    inv_e = 1.0 / E
    inv_n = 1.0 / N

    def batchnorm_train(t, ones_row, inv_rows, gamma, beta):
        # Training-mode BatchNorm1d with biased batch stats.  Sum and sum-of-squares ride
        # the MXU via a ones-vector matmul instead of cross-sublane VPU/XLU reductions.
        s1 = jnp.dot(ones_row, t, preferred_element_type=f32)        # [1, F]
        s2 = jnp.dot(ones_row, t * t, preferred_element_type=f32)    # [1, F]
        mu = s1 * inv_rows
        var = s2 * inv_rows - mu * mu
        return (t - mu) * lax.rsqrt(var + BN_EPS) * gamma + beta

    # ---- atom embedding (ATOM_PAD-aligned contraction) ----
    x = jnp.dot(v_ref[...], Wemb_ref[...], preferred_element_type=f32) + bemb_ref[...]   # [N, 64]

    # ---- CGCNN conv layers (statically unrolled) ----
    for l in range(NUM_CONV):
        # linear_src & linear_dst fused into one 256-lane matmul; the 128-lane split is
        # vreg-aligned (free).
        hsd = jnp.dot(x, Wsd_ref[l], preferred_element_type=f32) + bsd_ref[l]             # [N, 256]
        h_src = hsd[:, :GATE_F]                                                           # [N, 128]
        h_dst = hsd[:, GATE_F:]                                                           # [N, 128]
        h_edge = jnp.dot(ef, Wedge_ref[l], preferred_element_type=f32) + bedge_ref[l]     # [E, 128]
        # u_add_v gather via bf16 one-hot matmuls (f32 accumulate), 128-wide RHS so the
        # dominant E x N contractions use twice the MXU lanes of a split-half formulation.
        m = (jnp.dot(S, h_src.astype(bf16), preferred_element_type=f32)
             + jnp.dot(D, h_dst.astype(bf16), preferred_element_type=f32)
             + h_edge)                                                                     # [E, 128]
        m = batchnorm_train(m, ones_e, inv_e, gmsg_ref[l], bmsg_ref[l])
        # torch.chunk(m, 2, dim=1): filter = [:, :64], core = [:, 64:].  The 64-lane offset
        # slice is an XLU lane shift on an [E,64] tile — negligible next to the gathers.
        msg = _sigmoid(m[:, :NODE_F]) * _softplus(m[:, NODE_F:])                           # [E, 64]
        # Sum of messages over in-edges per node: h = D^T @ msg (transposed contraction;
        # no separate [N, E] scatter matrix is materialized).
        h = lax.dot_general(D, msg.astype(bf16),
                            dimension_numbers=(((0,), (0,)), ((), ())),
                            preferred_element_type=f32)                                    # [N, 64]
        h = batchnorm_train(h, ones_n, inv_n, gbn_ref[l], bbn_ref[l])
        x = _softplus(x + h)

    # ---- readout (AvgPooling per graph) + MLP head ----
    feats = jnp.dot(P_ref[...], x, preferred_element_type=f32)                             # [G, 64]
    feats = _softplus(feats)
    feats = _softplus(jnp.dot(feats, Wfc_ref[...], preferred_element_type=f32) + bfc_ref[...])  # fc = Linear+Softplus
    feats = _softplus(feats)
    # lane-dense head output: Wout/bout are zero-padded to HEAD_PAD columns; column 0 is real.
    out_ref[...] = jnp.dot(feats, Wout_ref[...], preferred_element_type=f32) + bout_ref[...]    # [G, HEAD_PAD]


def cgcnn_forward(r, v, src, dst, graph_ids, num_graphs, params):
    """CGCNN forward: trivial graph/RBF prep in JAX, hot path in one Pallas kernel."""
    E = int(r.shape[0])
    N = int(v.shape[0])
    G = int(num_graphs)

    # --- edge-feature prep (bondlength + RBF), stays out of the kernel ---
    d = jnp.sqrt(jnp.sum(r * r, axis=1))                                           # [E]
    centers = jnp.linspace(RBF_VMIN, RBF_VMAX, EDGE_F, dtype=jnp.float32)
    ef = jnp.exp(-RBF_GAMMA * (d[:, None] - centers[None, :]) ** 2)                # [E, 41]
    ef = jnp.pad(ef, ((0, 0), (0, EDGE_PAD - EDGE_F)))                             # [E, 64]

    # --- graph incidence / pooling operands ---
    S = jax.nn.one_hot(src, N, dtype=jnp.bfloat16)                                 # [E, N] exact 0/1
    D = jax.nn.one_hot(dst, N, dtype=jnp.bfloat16)                                 # [E, N] exact 0/1
    P = jax.nn.one_hot(graph_ids, G, dtype=jnp.float32).T                          # [G, N]
    P = P / jnp.sum(P, axis=1, keepdims=True)                                      # mean pooling (f32)

    # --- alignment padding / weight fusion (all zero-pads, exact) ---
    v_pad = jnp.pad(v, ((0, 0), (0, ATOM_PAD - ATOM_IN)))
    Wemb_pad = jnp.pad(params["Wemb"], ((0, ATOM_PAD - ATOM_IN), (0, 0)))
    Wsd = jnp.concatenate([params["Wsrc"], params["Wdst"]], axis=-1)               # [L, 64, 256]
    bsd = jnp.concatenate([params["bsrc"], params["bdst"]], axis=-1)               # [L, 1, 256]
    Wedge_pad = jnp.pad(params["Wedge"], ((0, 0), (0, EDGE_PAD - EDGE_F), (0, 0)))
    Wout_pad = jnp.pad(params["Wout"], ((0, 0), (0, HEAD_PAD - OUT_F)))
    bout_pad = jnp.pad(params["bout"], ((0, 0), (0, HEAD_PAD - OUT_F)))

    args = [
        ef, v_pad, S, D, P,
        Wemb_pad, params["bemb"],
        Wsd, bsd,
        Wedge_pad, params["bedge"],
        params["gmsg"], params["bmsg"],
        params["gbn"], params["bbn"],
        params["Wfc"], params["bfc"],
        Wout_pad, bout_pad,
    ]

    # --- explicit VMEM budget + advisory cost estimate ---
    in_bytes = sum(int(a.size) * a.dtype.itemsize for a in args)
    out_bytes = G * HEAD_PAD * 4
    act_bytes = 4 * (N * (2 * GATE_F + 4 * NODE_F) + E * (3 * GATE_F + 2 * NODE_F) + E * EDGE_PAD)
    vmem_limit = int(min(64 * 2**20, max(8 * 2**20, 2 * (in_bytes + out_bytes + act_bytes))))

    flops_layer = (
        2 * N * NODE_F * (2 * GATE_F)    # fused linear_src|linear_dst
        + 2 * E * EDGE_PAD * GATE_F      # linear_edge
        + 2 * 2 * E * N * GATE_F         # S / D one-hot gathers (128-wide)
        + 2 * E * N * NODE_F             # D^T scatter (message sum)
        + 4 * E * GATE_F + 4 * N * NODE_F  # BN sum / sum-of-squares matmuls
    )
    flops = (NUM_CONV * flops_layer
             + 2 * N * ATOM_PAD * NODE_F         # atom embedding
             + 2 * G * N * NODE_F                # mean pooling
             + 2 * G * NODE_F * FC_F             # fc
             + 2 * G * FC_F * HEAD_PAD)          # fc_out (padded)
    transcendentals = (NUM_CONV * (3 * E * NODE_F + 2 * N * NODE_F)
                       + 2 * G * NODE_F + 4 * G * FC_F)

    out = pl.pallas_call(
        cgcnn_kernel,
        out_shape=jax.ShapeDtypeStruct((G, HEAD_PAD), jnp.float32),
        in_specs=[pl.BlockSpec(memory_space=pltpu.MemorySpace.VMEM) for _ in args],
        out_specs=pl.BlockSpec(memory_space=pltpu.MemorySpace.VMEM),
        compiler_params=pltpu.CompilerParams(vmem_limit_bytes=vmem_limit),
        cost_estimate=pl.CostEstimate(flops=int(flops),
                                      transcendentals=int(transcendentals),
                                      bytes_accessed=int(in_bytes + out_bytes)),
    )(*args)

    return jnp.squeeze(out[:, :OUT_F])    # torch.squeeze at the end of forward


if __name__ == "__main__":
    key = jax.random.PRNGKey(0)

    # small synthetic batched graph: 2 graphs x 8 nodes, 16 edges each
    G = 2
    N_PER, E_PER = 8, 16
    N, E = G * N_PER, G * E_PER

    def init(k, shape, scale=0.1):
        return scale * jax.random.normal(k, shape, jnp.float32)

    keys = iter(jax.random.split(key, 64))

    # graph structure (deterministic)
    src_list, dst_list = [], []
    for g in range(G):
        ks, kd = jax.random.split(jax.random.fold_in(key, 1000 + g))
        src_list.append(jax.random.randint(ks, (E_PER,), 0, N_PER) + g * N_PER)
        dst_list.append(jax.random.randint(kd, (E_PER,), 0, N_PER) + g * N_PER)
    src = jnp.concatenate(src_list)
    dst = jnp.concatenate(dst_list)
    graph_id = jnp.repeat(jnp.arange(G), N_PER)

    # graph data
    r = init(next(keys), (E, 3), scale=2.0)                 # edge displacement vectors
    v = init(next(keys), (N, ATOM_IN), scale=1.0)           # atom features

    # parameters (weights stored pre-transposed as [in, out], PyTorch-equivalent init scale)
    params = dict(
        Wemb=init(next(keys), (ATOM_IN, NODE_F)),
        bemb=init(next(keys), (1, NODE_F)),
        Wsrc=init(next(keys), (NUM_CONV, NODE_F, 2 * NODE_F)),
        bsrc=init(next(keys), (NUM_CONV, 1, 2 * NODE_F)),
        Wdst=init(next(keys), (NUM_CONV, NODE_F, 2 * NODE_F)),
        bdst=init(next(keys), (NUM_CONV, 1, 2 * NODE_F)),
        Wedge=init(next(keys), (NUM_CONV, EDGE_F, 2 * NODE_F)),
        bedge=init(next(keys), (NUM_CONV, 1, 2 * NODE_F)),
        gmsg=jnp.ones((NUM_CONV, 1, 2 * NODE_F), jnp.float32),    # BatchNorm weight
        bmsg=jnp.zeros((NUM_CONV, 1, 2 * NODE_F), jnp.float32),   # BatchNorm bias
        gbn=jnp.ones((NUM_CONV, 1, NODE_F), jnp.float32),
        bbn=jnp.zeros((NUM_CONV, 1, NODE_F), jnp.float32),
        Wfc=init(next(keys), (NODE_F, FC_F)),
        bfc=init(next(keys), (1, FC_F)),
        Wout=init(next(keys), (FC_F, OUT_F)),
        bout=init(next(keys), (1, OUT_F)),
    )

    fwd = jax.jit(cgcnn_forward, static_argnums=(5,))
    out = fwd(r, v, src, dst, graph_id, G, params)
    out = jax.block_until_ready(out)
    assert out.shape == (G,)
    assert bool(jnp.all(jnp.isfinite(out)))
    print("KERNEL_OK")
</pallas_src>

<mosaic_0001>
module attributes {stable_mosaic.version = 11 : i64} {
  func.func @cgcnn_kernel(%arg0: memref<32x64xf32, #tpu.memory_space<vmem>>, %arg1: memref<16x128xf32, #tpu.memory_space<vmem>>, %arg2: memref<32x16xbf16, #tpu.memory_space<vmem>>, %arg3: memref<32x16xbf16, #tpu.memory_space<vmem>>, %arg4: memref<2x16xf32, #tpu.memory_space<vmem>>, %arg5: memref<128x64xf32, #tpu.memory_space<vmem>>, %arg6: memref<1x64xf32, #tpu.memory_space<vmem>>, %arg7: memref<3x64x256xf32, #tpu.memory_space<vmem>>, %arg8: memref<3x1x256xf32, #tpu.memory_space<vmem>>, %arg9: memref<3x64x128xf32, #tpu.memory_space<vmem>>, %arg10: memref<3x1x128xf32, #tpu.memory_space<vmem>>, %arg11: memref<3x1x128xf32, #tpu.memory_space<vmem>>, %arg12: memref<3x1x128xf32, #tpu.memory_space<vmem>>, %arg13: memref<3x1x64xf32, #tpu.memory_space<vmem>>, %arg14: memref<3x1x64xf32, #tpu.memory_space<vmem>>, %arg15: memref<64x128xf32, #tpu.memory_space<vmem>>, %arg16: memref<1x128xf32, #tpu.memory_space<vmem>>, %arg17: memref<128x128xf32, #tpu.memory_space<vmem>>, %arg18: memref<1x128xf32, #tpu.memory_space<vmem>>, %arg19: memref<2x128xf32, #tpu.memory_space<vmem>>) attributes {dimension_semantics = [], scalar_prefetch = 0 : i64, scratch_operands = 0 : i64, tpu.core_type = #tpu.core_type<tc>} {
    %c0 = arith.constant 0 : index
    %c0_0 = arith.constant 0 : index
    %0 = vector.load %arg0[%c0, %c0_0] : memref<32x64xf32, #tpu.memory_space<vmem>>, vector<32x64xf32>
    %c0_1 = arith.constant 0 : index
    %c0_2 = arith.constant 0 : index
    %1 = vector.load %arg2[%c0_1, %c0_2] : memref<32x16xbf16, #tpu.memory_space<vmem>>, vector<32x16xbf16>
    %c0_3 = arith.constant 0 : index
    %c0_4 = arith.constant 0 : index
    %2 = vector.load %arg3[%c0_3, %c0_4] : memref<32x16xbf16, #tpu.memory_space<vmem>>, vector<32x16xbf16>
    %cst = arith.constant 1.000000e+00 : f32
    %3 = vector.broadcast %cst : f32 to vector<1x32xf32>
    %cst_5 = arith.constant 1.000000e+00 : f32
    %4 = vector.broadcast %cst_5 : f32 to vector<1x16xf32>
    %c0_6 = arith.constant 0 : index
    %c0_7 = arith.constant 0 : index
    %5 = vector.load %arg1[%c0_6, %c0_7] : memref<16x128xf32, #tpu.memory_space<vmem>>, vector<16x128xf32>
    %c0_8 = arith.constant 0 : index
    %c0_9 = arith.constant 0 : index
    %6 = vector.load %arg5[%c0_8, %c0_9] : memref<128x64xf32, #tpu.memory_space<vmem>>, vector<128x64xf32>
    %cst_10 = arith.constant dense<0.000000e+00> : vector<16x64xf32>
    %7 = tpu.matmul %5, %6, %cst_10 {dimension_numbers = #tpu.dot_dimension_numbers<[1], [0], [0], [1], [0, 0, 1, 1], [], []>} : vector<16x128xf32>, vector<128x64xf32>, vector<16x64xf32> -> vector<16x64xf32>
    %c0_11 = arith.constant 0 : index
    %c0_12 = arith.constant 0 : index
    %8 = vector.load %arg6[%c0_11, %c0_12] : memref<1x64xf32, #tpu.memory_space<vmem>>, vector<1x64xf32>
    %9 = vector.broadcast %8 : vector<1x64xf32> to vector<16x64xf32>
    %10 = arith.addf %7, %9 : vector<16x64xf32>
    %c0_13 = arith.constant 0 : index
    %c0_14 = arith.constant 0 : index
    %c0_15 = arith.constant 0 : index
    %11 = vector.load %arg7[%c0_13, %c0_14, %c0_15] : memref<3x64x256xf32, #tpu.memory_space<vmem>>, vector<1x64x256xf32>
    %12 = vector.shape_cast %11 : vector<1x64x256xf32> to vector<64x256xf32>
    %cst_16 = arith.constant dense<0.000000e+00> : vector<16x256xf32>
    %13 = tpu.matmul %10, %12, %cst_16 {dimension_numbers = #tpu.dot_dimension_numbers<[1], [0], [0], [1], [0, 0, 1, 1], [], []>} : vector<16x64xf32>, vector<64x256xf32>, vector<16x256xf32> -> vector<16x256xf32>
    %c0_17 = arith.constant 0 : index
    %c0_18 = arith.constant 0 : index
    %c0_19 = arith.constant 0 : index
    %14 = vector.load %arg8[%c0_17, %c0_18, %c0_19] : memref<3x1x256xf32, #tpu.memory_space<vmem>>, vector<1x1x256xf32>
    %15 = vector.shape_cast %14 : vector<1x1x256xf32> to vector<1x256xf32>
    %16 = vector.broadcast %15 : vector<1x256xf32> to vector<16x256xf32>
    %17 = arith.addf %13, %16 : vector<16x256xf32>
    %18 = vector.extract_strided_slice %17 {offsets = [0, 0], sizes = [16, 128], strides = [1, 1]} : vector<16x256xf32> to vector<16x128xf32>
    %19 = vector.extract_strided_slice %17 {offsets = [0, 128], sizes = [16, 128], strides = [1, 1]} : vector<16x256xf32> to vector<16x128xf32>
    %c0_20 = arith.constant 0 : index
    %c0_21 = arith.constant 0 : index
    %c0_22 = arith.constant 0 : index
    %20 = vector.load %arg9[%c0_20, %c0_21, %c0_22] : memref<3x64x128xf32, #tpu.memory_space<vmem>>, vector<1x64x128xf32>
    %21 = vector.shape_cast %20 : vector<1x64x128xf32> to vector<64x128xf32>
    %cst_23 = arith.constant dense<0.000000e+00> : vector<32x128xf32>
    %22 = tpu.matmul %0, %21, %cst_23 {dimension_numbers = #tpu.dot_dimension_numbers<[1], [0], [0], [1], [0, 0, 1, 1], [], []>} : vector<32x64xf32>, vector<64x128xf32>, vector<32x128xf32> -> vector<32x128xf32>
    %c0_24 = arith.constant 0 : index
    %c0_25 = arith.constant 0 : index
    %c0_26 = arith.constant 0 : index
    %23 = vector.load %arg10[%c0_24, %c0_25, %c0_26] : memref<3x1x128xf32, #tpu.memory_space<vmem>>, vector<1x1x128xf32>
    %24 = vector.shape_cast %23 : vector<1x1x128xf32> to vector<1x128xf32>
    %25 = vector.broadcast %24 : vector<1x128xf32> to vector<32x128xf32>
    %26 = arith.addf %22, %25 : vector<32x128xf32>
    %27 = arith.truncf %18 : vector<16x128xf32> to vector<16x128xbf16>
    %cst_27 = arith.constant dense<0.000000e+00> : vector<32x128xf32>
    %28 = tpu.matmul %1, %27, %cst_27 {dimension_numbers = #tpu.dot_dimension_numbers<[1], [0], [0], [1], [0, 0, 1, 1], [], []>} : vector<32x16xbf16>, vector<16x128xbf16>, vector<32x128xf32> -> vector<32x128xf32>
    %29 = arith.truncf %19 : vector<16x128xf32> to vector<16x128xbf16>
    %cst_28 = arith.constant dense<0.000000e+00> : vector<32x128xf32>
    %30 = tpu.matmul %2, %29, %cst_28 {dimension_numbers = #tpu.dot_dimension_numbers<[1], [0], [0], [1], [0, 0, 1, 1], [], []>} : vector<32x16xbf16>, vector<16x128xbf16>, vector<32x128xf32> -> vector<32x128xf32>
    %31 = arith.addf %28, %30 : vector<32x128xf32>
    %32 = arith.addf %31, %26 : vector<32x128xf32>
    %c0_29 = arith.constant 0 : index
    %c0_30 = arith.constant 0 : index
    %c0_31 = arith.constant 0 : index
    %33 = vector.load %arg11[%c0_29, %c0_30, %c0_31] : memref<3x1x128xf32, #tpu.memory_space<vmem>>, vector<1x1x128xf32>
    %34 = vector.shape_cast %33 : vector<1x1x128xf32> to vector<1x128xf32>
    %c0_32 = arith.constant 0 : index
    %c0_33 = arith.constant 0 : index
    %c0_34 = arith.constant 0 : index
    %35 = vector.load %arg12[%c0_32, %c0_33, %c0_34] : memref<3x1x128xf32, #tpu.memory_space<vmem>>, vector<1x1x128xf32>
    %36 = vector.shape_cast %35 : vector<1x1x128xf32> to vector<1x128xf32>
    %cst_35 = arith.constant dense<0.000000e+00> : vector<1x128xf32>
    %37 = tpu.matmul %3, %32, %cst_35 {dimension_numbers = #tpu.dot_dimension_numbers<[1], [0], [0], [1], [0, 0, 1, 1], [], []>} : vector<1x32xf32>, vector<32x128xf32>, vector<1x128xf32> -> vector<1x128xf32>
    %38 = arith.mulf %32, %32 : vector<32x128xf32>
    %cst_36 = arith.constant dense<0.000000e+00> : vector<1x128xf32>
    %39 = tpu.matmul %3, %38, %cst_36 {dimension_numbers = #tpu.dot_dimension_numbers<[1], [0], [0], [1], [0, 0, 1, 1], [], []>} : vector<1x32xf32>, vector<32x128xf32>, vector<1x128xf32> -> vector<1x128xf32>
    %cst_37 = arith.constant 3.125000e-02 : f32
    %40 = vector.broadcast %cst_37 : f32 to vector<1x128xf32>
    %41 = arith.mulf %37, %40 : vector<1x128xf32>
    %cst_38 = arith.constant 3.125000e-02 : f32
    %42 = vector.broadcast %cst_38 : f32 to vector<1x128xf32>
    %43 = arith.mulf %39, %42 : vector<1x128xf32>
    %44 = arith.mulf %41, %41 : vector<1x128xf32>
    %45 = arith.subf %43, %44 : vector<1x128xf32>
    %46 = vector.broadcast %41 : vector<1x128xf32> to vector<32x128xf32>
    %47 = arith.subf %32, %46 : vector<32x128xf32>
    %cst_39 = arith.constant 9.99999974E-6 : f32
    %48 = vector.broadcast %cst_39 : f32 to vector<1x128xf32>
    %49 = arith.addf %45, %48 : vector<1x128xf32>
    %50 = math.rsqrt %49 : vector<1x128xf32>
    %51 = vector.broadcast %50 : vector<1x128xf32> to vector<32x128xf32>
    %52 = arith.mulf %47, %51 : vector<32x128xf32>
    %53 = vector.broadcast %34 : vector<1x128xf32> to vector<32x128xf32>
    %54 = arith.mulf %52, %53 : vector<32x128xf32>
    %55 = vector.broadcast %36 : vector<1x128xf32> to vector<32x128xf32>
    %56 = arith.addf %54, %55 : vector<32x128xf32>
    %57 = vector.extract_strided_slice %56 {offsets = [0, 0], sizes = [32, 64], strides = [1, 1]} : vector<32x128xf32> to vector<32x64xf32>
    %cst_40 = arith.constant 0.000000e+00 : f32
    %58 = vector.broadcast %cst_40 : f32 to vector<32x64xf32>
    %59 = arith.subf %58, %57 : vector<32x64xf32>
    %60 = math.exp %59 : vector<32x64xf32>
    %cst_41 = arith.constant 1.000000e+00 : f32
    %61 = vector.broadcast %cst_41 : f32 to vector<32x64xf32>
    %62 = arith.addf %61, %60 : vector<32x64xf32>
    %cst_42 = arith.constant 1.000000e+00 : f32
    %63 = vector.broadcast %cst_42 : f32 to vector<32x64xf32>
    %64 = arith.divf %63, %62 : vector<32x64xf32>
    %65 = vector.extract_strided_slice %56 {offsets = [0, 64], sizes = [32, 64], strides = [1, 1]} : vector<32x128xf32> to vector<32x64xf32>
    %cst_43 = arith.constant 0.000000e+00 : f32
    %66 = vector.broadcast %cst_43 : f32 to vector<32x64xf32>
    %67 = arith.maximumf %65, %66 : vector<32x64xf32>
    %68 = math.absf %65 : vector<32x64xf32>
    %cst_44 = arith.constant 0.000000e+00 : f32
    %69 = vector.broadcast %cst_44 : f32 to vector<32x64xf32>
    %70 = arith.subf %69, %68 : vector<32x64xf32>
    %71 = math.exp %70 : vector<32x64xf32>
    %72 = math.log1p %71 : vector<32x64xf32>
    %73 = arith.addf %67, %72 : vector<32x64xf32>
    %74 = arith.mulf %64, %73 : vector<32x64xf32>
    %75 = arith.truncf %74 : vector<32x64xf32> to vector<32x64xbf16>
    %cst_45 = arith.constant dense<0.000000e+00> : vector<16x64xf32>
    %76 = tpu.matmul %2, %75, %cst_45 {dimension_numbers = #tpu.dot_dimension_numbers<[0], [0], [1], [1], [0, 1, 1, 1], [], []>} : vector<32x16xbf16>, vector<32x64xbf16>, vector<16x64xf32> -> vector<16x64xf32>
    %c0_46 = arith.constant 0 : index
    %c0_47 = arith.constant 0 : index
    %c0_48 = arith.constant 0 : index
    %77 = vector.load %arg13[%c0_46, %c0_47, %c0_48] : memref<3x1x64xf32, #tpu.memory_space<vmem>>, vector<1x1x64xf32>
    %78 = vector.shape_cast %77 : vector<1x1x64xf32> to vector<1x64xf32>
    %c0_49 = arith.constant 0 : index
    %c0_50 = arith.constant 0 : index
    %c0_51 = arith.constant 0 : index
    %79 = vector.load %arg14[%c0_49, %c0_50, %c0_51] : memref<3x1x64xf32, #tpu.memory_space<vmem>>, vector<1x1x64xf32>
    %80 = vector.shape_cast %79 : vector<1x1x64xf32> to vector<1x64xf32>
    %cst_52 = arith.constant dense<0.000000e+00> : vector<1x64xf32>
    %81 = tpu.matmul %4, %76, %cst_52 {dimension_numbers = #tpu.dot_dimension_numbers<[1], [0], [0], [1], [0, 0, 1, 1], [], []>} : vector<1x16xf32>, vector<16x64xf32>, vector<1x64xf32> -> vector<1x64xf32>
    %82 = arith.mulf %76, %76 : vector<16x64xf32>
    %cst_53 = arith.constant dense<0.000000e+00> : vector<1x64xf32>
    %83 = tpu.matmul %4, %82, %cst_53 {dimension_numbers = #tpu.dot_dimension_numbers<[1], [0], [0], [1], [0, 0, 1, 1], [], []>} : vector<1x16xf32>, vector<16x64xf32>, vector<1x64xf32> -> vector<1x64xf32>
    %cst_54 = arith.constant 6.250000e-02 : f32
    %84 = vector.broadcast %cst_54 : f32 to vector<1x64xf32>
    %85 = arith.mulf %81, %84 : vector<1x64xf32>
    %cst_55 = arith.constant 6.250000e-02 : f32
    %86 = vector.broadcast %cst_55 : f32 to vector<1x64xf32>
    %87 = arith.mulf %83, %86 : vector<1x64xf32>
    %88 = arith.mulf %85, %85 : vector<1x64xf32>
    %89 = arith.subf %87, %88 : vector<1x64xf32>
    %90 = vector.broadcast %85 : vector<1x64xf32> to vector<16x64xf32>
    %91 = arith.subf %76, %90 : vector<16x64xf32>
    %cst_56 = arith.constant 9.99999974E-6 : f32
    %92 = vector.broadcast %cst_56 : f32 to vector<1x64xf32>
    %93 = arith.addf %89, %92 : vector<1x64xf32>
    %94 = math.rsqrt %93 : vector<1x64xf32>
    %95 = vector.broadcast %94 : vector<1x64xf32> to vector<16x64xf32>
    %96 = arith.mulf %91, %95 : vector<16x64xf32>
    %97 = vector.broadcast %78 : vector<1x64xf32> to vector<16x64xf32>
    %98 = arith.mulf %96, %97 : vector<16x64xf32>
    %99 = vector.broadcast %80 : vector<1x64xf32> to vector<16x64xf32>
    %100 = arith.addf %98, %99 : vector<16x64xf32>
    %101 = arith.addf %10, %100 : vector<16x64xf32>
    %cst_57 = arith.constant 0.000000e+00 : f32
    %102 = vector.broadcast %cst_57 : f32 to vector<16x64xf32>
    %103 = arith.maximumf %101, %102 : vector<16x64xf32>
    %104 = math.absf %101 : vector<16x64xf32>
    %cst_58 = arith.constant 0.000000e+00 : f32
    %105 = vector.broadcast %cst_58 : f32 to vector<16x64xf32>
    %106 = arith.subf %105, %104 : vector<16x64xf32>
    %107 = math.exp %106 : vector<16x64xf32>
    %108 = math.log1p %107 : vector<16x64xf32>
    %109 = arith.addf %103, %108 : vector<16x64xf32>
    %c1 = arith.constant 1 : index
    %c0_59 = arith.constant 0 : index
    %c0_60 = arith.constant 0 : index
    %110 = vector.load %arg7[%c1, %c0_59, %c0_60] : memref<3x64x256xf32, #tpu.memory_space<vmem>>, vector<1x64x256xf32>
    %111 = vector.shape_cast %110 : vector<1x64x256xf32> to vector<64x256xf32>
    %cst_61 = arith.constant dense<0.000000e+00> : vector<16x256xf32>
    %112 = tpu.matmul %109, %111, %cst_61 {dimension_numbers = #tpu.dot_dimension_numbers<[1], [0], [0], [1], [0, 0, 1, 1], [], []>} : vector<16x64xf32>, vector<64x256xf32>, vector<16x256xf32> -> vector<16x256xf32>
    %c1_62 = arith.constant 1 : index
    %c0_63 = arith.constant 0 : index
    %c0_64 = arith.constant 0 : index
    %113 = vector.load %arg8[%c1_62, %c0_63, %c0_64] : memref<3x1x256xf32, #tpu.memory_space<vmem>>, vector<1x1x256xf32>
    %114 = vector.shape_cast %113 : vector<1x1x256xf32> to vector<1x256xf32>
    %115 = vector.broadcast %114 : vector<1x256xf32> to vector<16x256xf32>
    %116 = arith.addf %112, %115 : vector<16x256xf32>
    %117 = vector.extract_strided_slice %116 {offsets = [0, 0], sizes = [16, 128], strides = [1, 1]} : vector<16x256xf32> to vector<16x128xf32>
    %118 = vector.extract_strided_slice %116 {offsets = [0, 128], sizes = [16, 128], strides = [1, 1]} : vector<16x256xf32> to vector<16x128xf32>
    %c1_65 = arith.constant 1 : index
    %c0_66 = arith.constant 0 : index
    %c0_67 = arith.constant 0 : index
    %119 = vector.load %arg9[%c1_65, %c0_66, %c0_67] : memref<3x64x128xf32, #tpu.memory_space<vmem>>, vector<1x64x128xf32>
    %120 = vector.shape_cast %119 : vector<1x64x128xf32> to vector<64x128xf32>
    %cst_68 = arith.constant dense<0.000000e+00> : vector<32x128xf32>
    %121 = tpu.matmul %0, %120, %cst_68 {dimension_numbers = #tpu.dot_dimension_numbers<[1], [0], [0], [1], [0, 0, 1, 1], [], []>} : vector<32x64xf32>, vector<64x128xf32>, vector<32x128xf32> -> vector<32x128xf32>
    %c1_69 = arith.constant 1 : index
    %c0_70 = arith.constant 0 : index
    %c0_71 = arith.constant 0 : index
    %122 = vector.load %arg10[%c1_69, %c0_70, %c0_71] : memref<3x1x128xf32, #tpu.memory_space<vmem>>, vector<1x1x128xf32>
    %123 = vector.shape_cast %122 : vector<1x1x128xf32> to vector<1x128xf32>
    %124 = vector.broadcast %123 : vector<1x128xf32> to vector<32x128xf32>
    %125 = arith.addf %121, %124 : vector<32x128xf32>
    %126 = arith.truncf %117 : vector<16x128xf32> to vector<16x128xbf16>
    %cst_72 = arith.constant dense<0.000000e+00> : vector<32x128xf32>
    %127 = tpu.matmul %1, %126, %cst_72 {dimension_numbers = #tpu.dot_dimension_numbers<[1], [0], [0], [1], [0, 0, 1, 1], [], []>} : vector<32x16xbf16>, vector<16x128xbf16>, vector<32x128xf32> -> vector<32x128xf32>
    %128 = arith.truncf %118 : vector<16x128xf32> to vector<16x128xbf16>
    %cst_73 = arith.constant dense<0.000000e+00> : vector<32x128xf32>
    %129 = tpu.matmul %2, %128, %cst_73 {dimension_numbers = #tpu.dot_dimension_numbers<[1], [0], [0], [1], [0, 0, 1, 1], [], []>} : vector<32x16xbf16>, vector<16x128xbf16>, vector<32x128xf32> -> vector<32x128xf32>
    %130 = arith.addf %127, %129 : vector<32x128xf32>
    %131 = arith.addf %130, %125 : vector<32x128xf32>
    %c1_74 = arith.constant 1 : index
    %c0_75 = arith.constant 0 : index
    %c0_76 = arith.constant 0 : index
    %132 = vector.load %arg11[%c1_74, %c0_75, %c0_76] : memref<3x1x128xf32, #tpu.memory_space<vmem>>, vector<1x1x128xf32>
    %133 = vector.shape_cast %132 : vector<1x1x128xf32> to vector<1x128xf32>
    %c1_77 = arith.constant 1 : index
    %c0_78 = arith.constant 0 : index
    %c0_79 = arith.constant 0 : index
    %134 = vector.load %arg12[%c1_77, %c0_78, %c0_79] : memref<3x1x128xf32, #tpu.memory_space<vmem>>, vector<1x1x128xf32>
    %135 = vector.shape_cast %134 : vector<1x1x128xf32> to vector<1x128xf32>
    %cst_80 = arith.constant dense<0.000000e+00> : vector<1x128xf32>
    %136 = tpu.matmul %3, %131, %cst_80 {dimension_numbers = #tpu.dot_dimension_numbers<[1], [0], [0], [1], [0, 0, 1, 1], [], []>} : vector<1x32xf32>, vector<32x128xf32>, vector<1x128xf32> -> vector<1x128xf32>
    %137 = arith.mulf %131, %131 : vector<32x128xf32>
    %cst_81 = arith.constant dense<0.000000e+00> : vector<1x128xf32>
    %138 = tpu.matmul %3, %137, %cst_81 {dimension_numbers = #tpu.dot_dimension_numbers<[1], [0], [0], [1], [0, 0, 1, 1], [], []>} : vector<1x32xf32>, vector<32x128xf32>, vector<1x128xf32> -> vector<1x128xf32>
    %cst_82 = arith.constant 3.125000e-02 : f32
    %139 = vector.broadcast %cst_82 : f32 to vector<1x128xf32>
    %140 = arith.mulf %136, %139 : vector<1x128xf32>
    %cst_83 = arith.constant 3.125000e-02 : f32
    %141 = vector.broadcast %cst_83 : f32 to vector<1x128xf32>
    %142 = arith.mulf %138, %141 : vector<1x128xf32>
    %143 = arith.mulf %140, %140 : vector<1x128xf32>
    %144 = arith.subf %142, %143 : vector<1x128xf32>
    %145 = vector.broadcast %140 : vector<1x128xf32> to vector<32x128xf32>
    %146 = arith.subf %131, %145 : vector<32x128xf32>
    %cst_84 = arith.constant 9.99999974E-6 : f32
    %147 = vector.broadcast %cst_84 : f32 to vector<1x128xf32>
    %148 = arith.addf %144, %147 : vector<1x128xf32>
    %149 = math.rsqrt %148 : vector<1x128xf32>
    %150 = vector.broadcast %149 : vector<1x128xf32> to vector<32x128xf32>
    %151 = arith.mulf %146, %150 : vector<32x128xf32>
    %152 = vector.broadcast %133 : vector<1x128xf32> to vector<32x128xf32>
    %153 = arith.mulf %151, %152 : vector<32x128xf32>
    %154 = vector.broadcast %135 : vector<1x128xf32> to vector<32x128xf32>
    %155 = arith.addf %153, %154 : vector<32x128xf32>
    %156 = vector.extract_strided_slice %155 {offsets = [0, 0], sizes = [32, 64], strides = [1, 1]} : vector<32x128xf32> to vector<32x64xf32>
    %cst_85 = arith.constant 0.000000e+00 : f32
    %157 = vector.broadcast %cst_85 : f32 to vector<32x64xf32>
    %158 = arith.subf %157, %156 : vector<32x64xf32>
    %159 = math.exp %158 : vector<32x64xf32>
    %cst_86 = arith.constant 1.000000e+00 : f32
    %160 = vector.broadcast %cst_86 : f32 to vector<32x64xf32>
    %161 = arith.addf %160, %159 : vector<32x64xf32>
    %cst_87 = arith.constant 1.000000e+00 : f32
    %162 = vector.broadcast %cst_87 : f32 to vector<32x64xf32>
    %163 = arith.divf %162, %161 : vector<32x64xf32>
    %164 = vector.extract_strided_slice %155 {offsets = [0, 64], sizes = [32, 64], strides = [1, 1]} : vector<32x128xf32> to vector<32x64xf32>
    %cst_88 = arith.constant 0.000000e+00 : f32
    %165 = vector.broadcast %cst_88 : f32 to vector<32x64xf32>
    %166 = arith.maximumf %164, %165 : vector<32x64xf32>
    %167 = math.absf %164 : vector<32x64xf32>
    %cst_89 = arith.constant 0.000000e+00 : f32
    %168 = vector.broadcast %cst_89 : f32 to vector<32x64xf32>
    %169 = arith.subf %168, %167 : vector<32x64xf32>
    %170 = math.exp %169 : vector<32x64xf32>
    %171 = math.log1p %170 : vector<32x64xf32>
    %172 = arith.addf %166, %171 : vector<32x64xf32>
    %173 = arith.mulf %163, %172 : vector<32x64xf32>
    %174 = arith.truncf %173 : vector<32x64xf32> to vector<32x64xbf16>
    %cst_90 = arith.constant dense<0.000000e+00> : vector<16x64xf32>
    %175 = tpu.matmul %2, %174, %cst_90 {dimension_numbers = #tpu.dot_dimension_numbers<[0], [0], [1], [1], [0, 1, 1, 1], [], []>} : vector<32x16xbf16>, vector<32x64xbf16>, vector<16x64xf32> -> vector<16x64xf32>
    %c1_91 = arith.constant 1 : index
    %c0_92 = arith.constant 0 : index
    %c0_93 = arith.constant 0 : index
    %176 = vector.load %arg13[%c1_91, %c0_92, %c0_93] : memref<3x1x64xf32, #tpu.memory_space<vmem>>, vector<1x1x64xf32>
    %177 = vector.shape_cast %176 : vector<1x1x64xf32> to vector<1x64xf32>
    %c1_94 = arith.constant 1 : index
    %c0_95 = arith.constant 0 : index
    %c0_96 = arith.constant 0 : index
    %178 = vector.load %arg14[%c1_94, %c0_95, %c0_96] : memref<3x1x64xf32, #tpu.memory_space<vmem>>, vector<1x1x64xf32>
    %179 = vector.shape_cast %178 : vector<1x1x64xf32> to vector<1x64xf32>
    %cst_97 = arith.constant dense<0.000000e+00> : vector<1x64xf32>
    %180 = tpu.matmul %4, %175, %cst_97 {dimension_numbers = #tpu.dot_dimension_numbers<[1], [0], [0], [1], [0, 0, 1, 1], [], []>} : vector<1x16xf32>, vector<16x64xf32>, vector<1x64xf32> -> vector<1x64xf32>
    %181 = arith.mulf %175, %175 : vector<16x64xf32>
    %cst_98 = arith.constant dense<0.000000e+00> : vector<1x64xf32>
    %182 = tpu.matmul %4, %181, %cst_98 {dimension_numbers = #tpu.dot_dimension_numbers<[1], [0], [0], [1], [0, 0, 1, 1], [], []>} : vector<1x16xf32>, vector<16x64xf32>, vector<1x64xf32> -> vector<1x64xf32>
    %cst_99 = arith.constant 6.250000e-02 : f32
    %183 = vector.broadcast %cst_99 : f32 to vector<1x64xf32>
    %184 = arith.mulf %180, %183 : vector<1x64xf32>
    %cst_100 = arith.constant 6.250000e-02 : f32
    %185 = vector.broadcast %cst_100 : f32 to vector<1x64xf32>
    %186 = arith.mulf %182, %185 : vector<1x64xf32>
    %187 = arith.mulf %184, %184 : vector<1x64xf32>
    %188 = arith.subf %186, %187 : vector<1x64xf32>
    %189 = vector.broadcast %184 : vector<1x64xf32> to vector<16x64xf32>
    %190 = arith.subf %175, %189 : vector<16x64xf32>
    %cst_101 = arith.constant 9.99999974E-6 : f32
    %191 = vector.broadcast %cst_101 : f32 to vector<1x64xf32>
    %192 = arith.addf %188, %191 : vector<1x64xf32>
    %193 = math.rsqrt %192 : vector<1x64xf32>
    %194 = vector.broadcast %193 : vector<1x64xf32> to vector<16x64xf32>
    %195 = arith.mulf %190, %194 : vector<16x64xf32>
    %196 = vector.broadcast %177 : vector<1x64xf32> to vector<16x64xf32>
    %197 = arith.mulf %195, %196 : vector<16x64xf32>
    %198 = vector.broadcast %179 : vector<1x64xf32> to vector<16x64xf32>
    %199 = arith.addf %197, %198 : vector<16x64xf32>
    %200 = arith.addf %109, %199 : vector<16x64xf32>
    %cst_102 = arith.constant 0.000000e+00 : f32
    %201 = vector.broadcast %cst_102 : f32 to vector<16x64xf32>
    %202 = arith.maximumf %200, %201 : vector<16x64xf32>
    %203 = math.absf %200 : vector<16x64xf32>
    %cst_103 = arith.constant 0.000000e+00 : f32
    %204 = vector.broadcast %cst_103 : f32 to vector<16x64xf32>
    %205 = arith.subf %204, %203 : vector<16x64xf32>
    %206 = math.exp %205 : vector<16x64xf32>
    %207 = math.log1p %206 : vector<16x64xf32>
    %208 = arith.addf %202, %207 : vector<16x64xf32>
    %c2 = arith.constant 2 : index
    %c0_104 = arith.constant 0 : index
    %c0_105 = arith.constant 0 : index
    %209 = vector.load %arg7[%c2, %c0_104, %c0_105] : memref<3x64x256xf32, #tpu.memory_space<vmem>>, vector<1x64x256xf32>
    %210 = vector.shape_cast %209 : vector<1x64x256xf32> to vector<64x256xf32>
    %cst_106 = arith.constant dense<0.000000e+00> : vector<16x256xf32>
    %211 = tpu.matmul %208, %210, %cst_106 {dimension_numbers = #tpu.dot_dimension_numbers<[1], [0], [0], [1], [0, 0, 1, 1], [], []>} : vector<16x64xf32>, vector<64x256xf32>, vector<16x256xf32> -> vector<16x256xf32>
    %c2_107 = arith.constant 2 : index
    %c0_108 = arith.constant 0 : index
    %c0_109 = arith.constant 0 : index
    %212 = vector.load %arg8[%c2_107, %c0_108, %c0_109] : memref<3x1x256xf32, #tpu.memory_space<vmem>>, vector<1x1x256xf32>
    %213 = vector.shape_cast %212 : vector<1x1x256xf32> to vector<1x256xf32>
    %214 = vector.broadcast %213 : vector<1x256xf32> to vector<16x256xf32>
    %215 = arith.addf %211, %214 : vector<16x256xf32>
    %216 = vector.extract_strided_slice %215 {offsets = [0, 0], sizes = [16, 128], strides = [1, 1]} : vector<16x256xf32> to vector<16x128xf32>
    %217 = vector.extract_strided_slice %215 {offsets = [0, 128], sizes = [16, 128], strides = [1, 1]} : vector<16x256xf32> to vector<16x128xf32>
    %c2_110 = arith.constant 2 : index
    %c0_111 = arith.constant 0 : index
    %c0_112 = arith.constant 0 : index
    %218 = vector.load %arg9[%c2_110, %c0_111, %c0_112] : memref<3x64x128xf32, #tpu.memory_space<vmem>>, vector<1x64x128xf32>
    %219 = vector.shape_cast %218 : vector<1x64x128xf32> to vector<64x128xf32>
    %cst_113 = arith.constant dense<0.000000e+00> : vector<32x128xf32>
    %220 = tpu.matmul %0, %219, %cst_113 {dimension_numbers = #tpu.dot_dimension_numbers<[1], [0], [0], [1], [0, 0, 1, 1], [], []>} : vector<32x64xf32>, vector<64x128xf32>, vector<32x128xf32> -> vector<32x128xf32>
    %c2_114 = arith.constant 2 : index
    %c0_115 = arith.constant 0 : index
    %c0_116 = arith.constant 0 : index
    %221 = vector.load %arg10[%c2_114, %c0_115, %c0_116] : memref<3x1x128xf32, #tpu.memory_space<vmem>>, vector<1x1x128xf32>
    %222 = vector.shape_cast %221 : vector<1x1x128xf32> to vector<1x128xf32>
    %223 = vector.broadcast %222 : vector<1x128xf32> to vector<32x128xf32>
    %224 = arith.addf %220, %223 : vector<32x128xf32>
    %225 = arith.truncf %216 : vector<16x128xf32> to vector<16x128xbf16>
    %cst_117 = arith.constant dense<0.000000e+00> : vector<32x128xf32>
    %226 = tpu.matmul %1, %225, %cst_117 {dimension_numbers = #tpu.dot_dimension_numbers<[1], [0], [0], [1], [0, 0, 1, 1], [], []>} : vector<32x16xbf16>, vector<16x128xbf16>, vector<32x128xf32> -> vector<32x128xf32>
    %227 = arith.truncf %217 : vector<16x128xf32> to vector<16x128xbf16>
    %cst_118 = arith.constant dense<0.000000e+00> : vector<32x128xf32>
    %228 = tpu.matmul %2, %227, %cst_118 {dimension_numbers = #tpu.dot_dimension_numbers<[1], [0], [0], [1], [0, 0, 1, 1], [], []>} : vector<32x16xbf16>, vector<16x128xbf16>, vector<32x128xf32> -> vector<32x128xf32>
    %229 = arith.addf %226, %228 : vector<32x128xf32>
    %230 = arith.addf %229, %224 : vector<32x128xf32>
    %c2_119 = arith.constant 2 : index
    %c0_120 = arith.constant 0 : index
    %c0_121 = arith.constant 0 : index
    %231 = vector.load %arg11[%c2_119, %c0_120, %c0_121] : memref<3x1x128xf32, #tpu.memory_space<vmem>>, vector<1x1x128xf32>
    %232 = vector.shape_cast %231 : vector<1x1x128xf32> to vector<1x128xf32>
    %c2_122 = arith.constant 2 : index
    %c0_123 = arith.constant 0 : index
    %c0_124 = arith.constant 0 : index
    %233 = vector.load %arg12[%c2_122, %c0_123, %c0_124] : memref<3x1x128xf32, #tpu.memory_space<vmem>>, vector<1x1x128xf32>
    %234 = vector.shape_cast %233 : vector<1x1x128xf32> to vector<1x128xf32>
    %cst_125 = arith.constant dense<0.000000e+00> : vector<1x128xf32>
    %235 = tpu.matmul %3, %230, %cst_125 {dimension_numbers = #tpu.dot_dimension_numbers<[1], [0], [0], [1], [0, 0, 1, 1], [], []>} : vector<1x32xf32>, vector<32x128xf32>, vector<1x128xf32> -> vector<1x128xf32>
    %236 = arith.mulf %230, %230 : vector<32x128xf32>
    %cst_126 = arith.constant dense<0.000000e+00> : vector<1x128xf32>
    %237 = tpu.matmul %3, %236, %cst_126 {dimension_numbers = #tpu.dot_dimension_numbers<[1], [0], [0], [1], [0, 0, 1, 1], [], []>} : vector<1x32xf32>, vector<32x128xf32>, vector<1x128xf32> -> vector<1x128xf32>
    %cst_127 = arith.constant 3.125000e-02 : f32
    %238 = vector.broadcast %cst_127 : f32 to vector<1x128xf32>
    %239 = arith.mulf %235, %238 : vector<1x128xf32>
    %cst_128 = arith.constant 3.125000e-02 : f32
    %240 = vector.broadcast %cst_128 : f32 to vector<1x128xf32>
    %241 = arith.mulf %237, %240 : vector<1x128xf32>
    %242 = arith.mulf %239, %239 : vector<1x128xf32>
    %243 = arith.subf %241, %242 : vector<1x128xf32>
    %244 = vector.broadcast %239 : vector<1x128xf32> to vector<32x128xf32>
    %245 = arith.subf %230, %244 : vector<32x128xf32>
    %cst_129 = arith.constant 9.99999974E-6 : f32
    %246 = vector.broadcast %cst_129 : f32 to vector<1x128xf32>
    %247 = arith.addf %243, %246 : vector<1x128xf32>
    %248 = math.rsqrt %247 : vector<1x128xf32>
    %249 = vector.broadcast %248 : vector<1x128xf32> to vector<32x128xf32>
    %250 = arith.mulf %245, %249 : vector<32x128xf32>
    %251 = vector.broadcast %232 : vector<1x128xf32> to vector<32x128xf32>
    %252 = arith.mulf %250, %251 : vector<32x128xf32>
    %253 = vector.broadcast %234 : vector<1x128xf32> to vector<32x128xf32>
    %254 = arith.addf %252, %253 : vector<32x128xf32>
    %255 = vector.extract_strided_slice %254 {offsets = [0, 0], sizes = [32, 64], strides = [1, 1]} : vector<32x128xf32> to vector<32x64xf32>
    %cst_130 = arith.constant 0.000000e+00 : f32
    %256 = vector.broadcast %cst_130 : f32 to vector<32x64xf32>
    %257 = arith.subf %256, %255 : vector<32x64xf32>
    %258 = math.exp %257 : vector<32x64xf32>
    %cst_131 = arith.constant 1.000000e+00 : f32
    %259 = vector.broadcast %cst_131 : f32 to vector<32x64xf32>
    %260 = arith.addf %259, %258 : vector<32x64xf32>
    %cst_132 = arith.constant 1.000000e+00 : f32
    %261 = vector.broadcast %cst_132 : f32 to vector<32x64xf32>
    %262 = arith.divf %261, %260 : vector<32x64xf32>
    %263 = vector.extract_strided_slice %254 {offsets = [0, 64], sizes = [32, 64], strides = [1, 1]} : vector<32x128xf32> to vector<32x64xf32>
    %cst_133 = arith.constant 0.000000e+00 : f32
    %264 = vector.broadcast %cst_133 : f32 to vector<32x64xf32>
    %265 = arith.maximumf %263, %264 : vector<32x64xf32>
    %266 = math.absf %263 : vector<32x64xf32>
    %cst_134 = arith.constant 0.000000e+00 : f32
    %267 = vector.broadcast %cst_134 : f32 to vector<32x64xf32>
    %268 = arith.subf %267, %266 : vector<32x64xf32>
    %269 = math.exp %268 : vector<32x64xf32>
    %270 = math.log1p %269 : vector<32x64xf32>
    %271 = arith.addf %265, %270 : vector<32x64xf32>
    %272 = arith.mulf %262, %271 : vector<32x64xf32>
    %273 = arith.truncf %272 : vector<32x64xf32> to vector<32x64xbf16>
    %cst_135 = arith.constant dense<0.000000e+00> : vector<16x64xf32>
    %274 = tpu.matmul %2, %273, %cst_135 {dimension_numbers = #tpu.dot_dimension_numbers<[0], [0], [1], [1], [0, 1, 1, 1], [], []>} : vector<32x16xbf16>, vector<32x64xbf16>, vector<16x64xf32> -> vector<16x64xf32>
    %c2_136 = arith.constant 2 : index
    %c0_137 = arith.constant 0 : index
    %c0_138 = arith.constant 0 : index
    %275 = vector.load %arg13[%c2_136, %c0_137, %c0_138] : memref<3x1x64xf32, #tpu.memory_space<vmem>>, vector<1x1x64xf32>
    %276 = vector.shape_cast %275 : vector<1x1x64xf32> to vector<1x64xf32>
    %c2_139 = arith.constant 2 : index
    %c0_140 = arith.constant 0 : index
    %c0_141 = arith.constant 0 : index
    %277 = vector.load %arg14[%c2_139, %c0_140, %c0_141] : memref<3x1x64xf32, #tpu.memory_space<vmem>>, vector<1x1x64xf32>
    %278 = vector.shape_cast %277 : vector<1x1x64xf32> to vector<1x64xf32>
    %cst_142 = arith.constant dense<0.000000e+00> : vector<1x64xf32>
    %279 = tpu.matmul %4, %274, %cst_142 {dimension_numbers = #tpu.dot_dimension_numbers<[1], [0], [0], [1], [0, 0, 1, 1], [], []>} : vector<1x16xf32>, vector<16x64xf32>, vector<1x64xf32> -> vector<1x64xf32>
    %280 = arith.mulf %274, %274 : vector<16x64xf32>
    %cst_143 = arith.constant dense<0.000000e+00> : vector<1x64xf32>
    %281 = tpu.matmul %4, %280, %cst_143 {dimension_numbers = #tpu.dot_dimension_numbers<[1], [0], [0], [1], [0, 0, 1, 1], [], []>} : vector<1x16xf32>, vector<16x64xf32>, vector<1x64xf32> -> vector<1x64xf32>
    %cst_144 = arith.constant 6.250000e-02 : f32
    %282 = vector.broadcast %cst_144 : f32 to vector<1x64xf32>
    %283 = arith.mulf %279, %282 : vector<1x64xf32>
    %cst_145 = arith.constant 6.250000e-02 : f32
    %284 = vector.broadcast %cst_145 : f32 to vector<1x64xf32>
    %285 = arith.mulf %281, %284 : vector<1x64xf32>
    %286 = arith.mulf %283, %283 : vector<1x64xf32>
    %287 = arith.subf %285, %286 : vector<1x64xf32>
    %288 = vector.broadcast %283 : vector<1x64xf32> to vector<16x64xf32>
    %289 = arith.subf %274, %288 : vector<16x64xf32>
    %cst_146 = arith.constant 9.99999974E-6 : f32
    %290 = vector.broadcast %cst_146 : f32 to vector<1x64xf32>
    %291 = arith.addf %287, %290 : vector<1x64xf32>
    %292 = math.rsqrt %291 : vector<1x64xf32>
    %293 = vector.broadcast %292 : vector<1x64xf32> to vector<16x64xf32>
    %294 = arith.mulf %289, %293 : vector<16x64xf32>
    %295 = vector.broadcast %276 : vector<1x64xf32> to vector<16x64xf32>
    %296 = arith.mulf %294, %295 : vector<16x64xf32>
    %297 = vector.broadcast %278 : vector<1x64xf32> to vector<16x64xf32>
    %298 = arith.addf %296, %297 : vector<16x64xf32>
    %299 = arith.addf %208, %298 : vector<16x64xf32>
    %cst_147 = arith.constant 0.000000e+00 : f32
    %300 = vector.broadcast %cst_147 : f32 to vector<16x64xf32>
    %301 = arith.maximumf %299, %300 : vector<16x64xf32>
    %302 = math.absf %299 : vector<16x64xf32>
    %cst_148 = arith.constant 0.000000e+00 : f32
    %303 = vector.broadcast %cst_148 : f32 to vector<16x64xf32>
    %304 = arith.subf %303, %302 : vector<16x64xf32>
    %305 = math.exp %304 : vector<16x64xf32>
    %306 = math.log1p %305 : vector<16x64xf32>
    %307 = arith.addf %301, %306 : vector<16x64xf32>
    %c0_149 = arith.constant 0 : index
    %c0_150 = arith.constant 0 : index
    %308 = vector.load %arg4[%c0_149, %c0_150] : memref<2x16xf32, #tpu.memory_space<vmem>>, vector<2x16xf32>
    %cst_151 = arith.constant dense<0.000000e+00> : vector<2x64xf32>
    %309 = tpu.matmul %308, %307, %cst_151 {dimension_numbers = #tpu.dot_dimension_numbers<[1], [0], [0], [1], [0, 0, 1, 1], [], []>} : vector<2x16xf32>, vector<16x64xf32>, vector<2x64xf32> -> vector<2x64xf32>
    %cst_152 = arith.constant 0.000000e+00 : f32
    %310 = vector.broadcast %cst_152 : f32 to vector<2x64xf32>
    %311 = arith.maximumf %309, %310 : vector<2x64xf32>
    %312 = math.absf %309 : vector<2x64xf32>
    %cst_153 = arith.constant 0.000000e+00 : f32
    %313 = vector.broadcast %cst_153 : f32 to vector<2x64xf32>
    %314 = arith.subf %313, %312 : vector<2x64xf32>
    %315 = math.exp %314 : vector<2x64xf32>
    %316 = math.log1p %315 : vector<2x64xf32>
    %317 = arith.addf %311, %316 : vector<2x64xf32>
    %c0_154 = arith.constant 0 : index
    %c0_155 = arith.constant 0 : index
    %318 = vector.load %arg15[%c0_154, %c0_155] : memref<64x128xf32, #tpu.memory_space<vmem>>, vector<64x128xf32>
    %cst_156 = arith.constant dense<0.000000e+00> : vector<2x128xf32>
    %319 = tpu.matmul %317, %318, %cst_156 {dimension_numbers = #tpu.dot_dimension_numbers<[1], [0], [0], [1], [0, 0, 1, 1], [], []>} : vector<2x64xf32>, vector<64x128xf32>, vector<2x128xf32> -> vector<2x128xf32>
    %c0_157 = arith.constant 0 : index
    %c0_158 = arith.constant 0 : index
    %320 = vector.load %arg16[%c0_157, %c0_158] : memref<1x128xf32, #tpu.memory_space<vmem>>, vector<1x128xf32>
    %321 = vector.broadcast %320 : vector<1x128xf32> to vector<2x128xf32>
    %322 = arith.addf %319, %321 : vector<2x128xf32>
    %cst_159 = arith.constant 0.000000e+00 : f32
    %323 = vector.broadcast %cst_159 : f32 to vector<2x128xf32>
    %324 = arith.maximumf %322, %323 : vector<2x128xf32>
    %325 = math.absf %322 : vector<2x128xf32>
    %cst_160 = arith.constant 0.000000e+00 : f32
    %326 = vector.broadcast %cst_160 : f32 to vector<2x128xf32>
    %327 = arith.subf %326, %325 : vector<2x128xf32>
    %328 = math.exp %327 : vector<2x128xf32>
    %329 = math.log1p %328 : vector<2x128xf32>
    %330 = arith.addf %324, %329 : vector<2x128xf32>
    %cst_161 = arith.constant 0.000000e+00 : f32
    %331 = vector.broadcast %cst_161 : f32 to vector<2x128xf32>
    %332 = arith.maximumf %330, %331 : vector<2x128xf32>
    %333 = math.absf %330 : vector<2x128xf32>
    %cst_162 = arith.constant 0.000000e+00 : f32
    %334 = vector.broadcast %cst_162 : f32 to vector<2x128xf32>
    %335 = arith.subf %334, %333 : vector<2x128xf32>
    %336 = math.exp %335 : vector<2x128xf32>
    %337 = math.log1p %336 : vector<2x128xf32>
    %338 = arith.addf %332, %337 : vector<2x128xf32>
    %c0_163 = arith.constant 0 : index
    %c0_164 = arith.constant 0 : index
    %339 = vector.load %arg17[%c0_163, %c0_164] : memref<128x128xf32, #tpu.memory_space<vmem>>, vector<128x128xf32>
    %cst_165 = arith.constant dense<0.000000e+00> : vector<2x128xf32>
    %340 = tpu.matmul %338, %339, %cst_165 {dimension_numbers = #tpu.dot_dimension_numbers<[1], [0], [0], [1], [0, 0, 1, 1], [], []>} : vector<2x128xf32>, vector<128x128xf32>, vector<2x128xf32> -> vector<2x128xf32>
    %c0_166 = arith.constant 0 : index
    %c0_167 = arith.constant 0 : index
    %341 = vector.load %arg18[%c0_166, %c0_167] : memref<1x128xf32, #tpu.memory_space<vmem>>, vector<1x128xf32>
    %342 = vector.broadcast %341 : vector<1x128xf32> to vector<2x128xf32>
    %343 = arith.addf %340, %342 : vector<2x128xf32>
    %c0_168 = arith.constant 0 : index
    %c0_169 = arith.constant 0 : index
    %344 = vector.load %arg19[%c0_168, %c0_169] : memref<2x128xf32, #tpu.memory_space<vmem>>, vector<2x128xf32>
    tpu.vector_store %arg19[%c0_168, %c0_169], %343 {strides = array<i32>} : memref<2x128xf32, #tpu.memory_space<vmem>>, vector<2x128xf32>,
    return
  }
}

</mosaic_0001>

<bundles_post_ra>
// kernel: cgcnn_forward.1
= control target key start
LH: loop header
LB: loop body
LE: loop exit
PB: predicated region body
PF: predicated region fallthrough
CT: control target
= control target key end

     0   :  { %v4161_v50 = vmov 0.0   ;;  %vm203_vm0 = vcmask 523264   ;;  %vm411_vm1 = vcmask 130048   ;;  %vm4163_vm2 = vmmov 0   ;;  %s5044_s5 = inlined_call_operand.vmem [shape: f32[128,64], index: 5, kind: input, shape index: {}]   ;;  %s5045_s1 = inlined_call_operand.vmem [shape: f32[16,128], index: 1, kind: input, shape index: {}]   ;;  %s5046_s7 = inlined_call_operand.vmem [shape: f32[3,64,256], index: 7, kind: input, shape index: {}]   ;;  %s5047_s9 = inlined_call_operand.vmem [shape: f32[3,64,128], index: 9, kind: input, shape index: {}]   ;;  %s5048_s6 = inlined_call_operand.vmem [shape: f32[1,64], index: 6, kind: input, shape index: {}]   ;;  %s5049_s0 = inlined_call_operand.vmem [shape: f32[32,64], index: 0, kind: input, shape index: {}]   ;;  %s5050_s2 = inlined_call_operand.vmem [shape: bf16[32,16], index: 2, kind: input, shape index: {}]   ;;  %s5051_s3 = inlined_call_operand.vmem [shape: bf16[32,16], index: 3, kind: input, shape index: {}]   ;;  %s5052_s8 = inlined_call_operand.vmem [shape: f32[3,1,256], index: 8, kind: input, shape index: {}]   ;;  %s5053_s10 = inlined_call_operand.vmem [shape: f32[3,1,128], index: 10, kind: input, shape index: {}]   ;;  %s5054_s11 = inlined_call_operand.vmem [shape: f32[3,1,128], index: 11, kind: input, shape index: {}]   ;;  %s5055_s12 = inlined_call_operand.vmem [shape: f32[3,1,128], index: 12, kind: input, shape index: {}]   ;;  %s5056_s13 = inlined_call_operand.vmem [shape: f32[3,1,64], index: 13, kind: input, shape index: {}]   ;;  %s5057_s14 = inlined_call_operand.vmem [shape: f32[3,1,64], index: 14, kind: input, shape index: {}]   ;;  %s5058_s4 = inlined_call_operand.vmem [shape: f32[2,16], index: 4, kind: input, shape index: {}]   ;;  %s5059_s15 = inlined_call_operand.vmem [shape: f32[64,128], index: 15, kind: input, shape index: {}]   ;;  %s5060_s17 = inlined_call_operand.vmem [shape: f32[128,128], index: 17, kind: input, shape index: {}]   ;;  %s5061_s16 = inlined_call_operand.vmem [shape: f32[1,128], index: 16, kind: input, shape index: {}]   ;;  %s5062_s18 = inlined_call_operand.vmem [shape: f32[1,128], index: 18, kind: input, shape index: {}]   ;;  %s5063_s19 = inlined_call_operand.vmem [shape: f32[2,128], index: 19, kind: output, shape index: {}]  }
   0x1   :  { %5068 = sst [smem:[#allocation2_spill]] %s5044_s5  ;;  %274 = vmatprep.mubr.f32.mxu1 %v4161_v50  ;;  %v3149_v54 = vld [vmem:[%s5048_s6] ss:$0 sm:$0xff]  ;;  %vm538_vm3 = vcmask 261120  }
   0x2   :  { %5069 = sst [smem:[#allocation3_spill]] %s5045_s1  ;;  %s5072_s20 = sld [smem:[#allocation2_spill]] }
   0x3   :  { %5070 = sst [smem:[#allocation4_spill]] %s5046_s7  ;;  %s5073_s22 = sld [smem:[#allocation3_spill]] }
   0x4   :  { %5071 = sst [smem:[#allocation5_spill]] %s5047_s9  ;;  %s5074_s24 = sld [smem:[#allocation4_spill]] }
   0x5   :  { %s5075_s25 = sld [smem:[#allocation5_spill]] }
   0x8   :  { %v77_v0 = vld [vmem:[%s5072_s20] sm:$0xff]  ;;  %v78_v1 = vld [vmem:[%s5072_s20 + $0x8] sm:$0xff]  ;;  %v79_v2 = vld [vmem:[%s5072_s20 + $0x10] sm:$0xff] }
   0x9   :  { %v3766_v3 = vpack.c.bf16 %v78_v1, %v77_v0  ;;  %v80_v4 = vld [vmem:[%s5072_s20 + $0x18] sm:$0xff]  ;;  %v81_v6 = vld [vmem:[%s5072_s20 + $0x20] sm:$0xff]  ;;  %v82_v7 = vld [vmem:[%s5072_s20 + $0x28] sm:$0xff] }
   0xa   :  { %v3770_v5 = vpack.c.bf16 %v80_v4, %v79_v2  ;;  %v3774_v8 = vpack.c.bf16 %v82_v7, %v81_v6  ;;  %v83_v9 = vld [vmem:[%s5072_s20 + $0x30] sm:$0xff]  ;;  %v84_v10 = vld [vmem:[%s5072_s20 + $0x38] sm:$0xff]  ;;  %v75_v11 = vld [vmem:[%s5073_s22] sm:$0xff] }
   0xb   :  { %3767 = vmatprep.subr.bf16.mxu0 %v3766_v3  ;;  %3468 = vmatprep.mubr.f32.mxu0 %v75_v11  ;;  %v176_v12 = vld [vmem:[%s5074_s24 + $0x8] sm:$0xff]  ;;  %v178_v13 = vld [vmem:[%s5074_s24 + $0x18] sm:$0xff]  ;;  %v175_v14 = vld [vmem:[%s5074_s24] sm:$0xff]  ;;  %v3778_v24 = vpack.c.bf16 %v84_v10, %v83_v9  ;;  %v193_v10 = vlaneseq }
   0xc   :  { %3769 = vmatpush3.bf16.msra.mxu0 %v3766_v3  ;;  %v3798_v15 = vpack.c.bf16 %v178_v13, %v176_v12  ;;  %v177_v16 = vld [vmem:[%s5074_s24 + $0x10] sm:$0xff]  ;;  %v180_v17 = vld [vmem:[%s5074_s24 + $0x28] sm:$0xff]  ;;  %v182_v18 = vld [vmem:[%s5074_s24 + $0x38] sm:$0xff] }
   0xd   :  { %3771 = vmatprep.subr.bf16.mxu0 %v3770_v5  ;;  %v3800_v19 = vpack.c.bf16 %v177_v16, %v175_v14  ;;  %v3802_v20 = vpack.c.bf16 %v182_v18, %v180_v17  ;;  %v179_v21 = vld [vmem:[%s5074_s24 + $0x20] sm:$0xff]  ;;  %v181_v22 = vld [vmem:[%s5074_s24 + $0x30] sm:$0xff]  ;;  %v184_v23 = vld [vmem:[%s5074_s24 + $0x48] sm:$0xff]  ;;  %v194_v11 = vshrl.u32 %v193_v10, 7 }
   0xe   :  { %3799 = vmatprep.subr.bf16.mxu1 %v3798_v15  ;;  %v186_v25 = vld [vmem:[%s5074_s24 + $0x58] sm:$0xff]  ;;  %v85_v26 = vld [vmem:[%s5072_s20 + $0x40] sm:$0xff]  ;;  %v86_v27 = vld [vmem:[%s5072_s20 + $0x48] sm:$0xff]  ;;  %v3804_v28 = vpack.c.bf16 %v181_v22, %v179_v21 }
   0xf   :  { %3801 = vmatpush1.bf16.msra.mxu1 %v3800_v19  ;;  %v3806_v29 = vpack.c.bf16 %v186_v25, %v184_v23  ;;  %v183_v30 = vld [vmem:[%s5074_s24 + $0x40] sm:$0xff]  ;;  %v185_v31 = vld [vmem:[%s5074_s24 + $0x50] sm:$0xff]  ;;  %v3782_v32 = vpack.c.bf16 %v86_v27, %v85_v26  ;;  %v88_v34 = vld [vmem:[%s5072_s20 + $0x58] sm:$0xff]  ;;  %v4447_v12 = vsub.s32 0, %v194_v11  ;;  %v4452_v14 = vsub.s32 1, %v194_v11 }
  0x10   :  { %3773 = vmatpush3.bf16.msra.mxu0 %v3770_v5  ;;  %3803 = vmatprep.subr.bf16.mxu1 %v3802_v20  ;;  %v87_v33 = vld [vmem:[%s5072_s20 + $0x50] sm:$0xff]  ;;  %v3808_v35 = vpack.c.bf16 %v185_v31, %v183_v30  ;;  %v89_v37 = vld [vmem:[%s5072_s20 + $0x60] sm:$0xff]  ;;  %v90_v38 = vld [vmem:[%s5072_s20 + $0x68] sm:$0xff] }
  0x11   :  { %3775 = vmatprep.subr.bf16.mxu0 %v3774_v8  ;;  %v3786_v36 = vpack.c.bf16 %v88_v34, %v87_v33  ;;  %v3790_v39 = vpack.c.bf16 %v90_v38, %v89_v37  ;;  %v91_v40 = vld [vmem:[%s5072_s20 + $0x70] sm:$0xff]  ;;  %v92_v41 = vld [vmem:[%s5072_s20 + $0x78] sm:$0xff]  ;;  %v76_v43 = vld [vmem:[%s5073_s22 + $0x8] sm:$0xff]  ;;  %v4162_v33 = vmov 0.0|0.0   ;;  %s4165_s22 = smov 64  }
  0x12   :  { %v3794_v42 = vpack.c.bf16 %v92_v41, %v91_v40  ;;  %v188_v44 = vld [vmem:[%s5074_s24 + $0x68] sm:$0xff]  ;;  %v190_v45 = vld [vmem:[%s5074_s24 + $0x78] sm:$0xff]  ;;  %v187_v47 = vld [vmem:[%s5074_s24 + $0x60] sm:$0xff] }
  0x13   :  { %3805 = vmatpush1.bf16.msra.mxu1 %v3804_v28  ;;  %v3810_v46 = vpack.c.bf16 %v190_v45, %v188_v44  ;;  %v189_v48 = vld [vmem:[%s5074_s24 + $0x70] sm:$0xff]  ;;  %v287_v51 = vld [vmem:[%s5075_s25] sm:$0xff]  ;;  %v288_v52 = vld [vmem:[%s5075_s25 + $0x8] sm:$0xff] }
  0x14   :  { %3777 = vmatpush3.bf16.msra.mxu0 %v3774_v8  ;;  %3807 = vmatprep.subr.bf16.mxu1 %v3806_v29  ;;  %v3812_v49 = vpack.c.bf16 %v189_v48, %v187_v47  ;;  %v3814_v53 = vpack.c.bf16 %v288_v52, %v287_v51  ;;  %v289_v55 = vld [vmem:[%s5075_s25 + $0x10] sm:$0xff]  ;;  %v290_v56 = vld [vmem:[%s5075_s25 + $0x18] sm:$0xff]  ;;  %v291_v61 = vld [vmem:[%s5075_s25 + $0x20] sm:$0xff] }
  0x15   :  { %3779 = vmatprep.subr.bf16.mxu0 %v3778_v24  ;;  %v3818_v60 = vpack.c.bf16 %v290_v56, %v289_v55  ;;  %v292_v62 = vld [vmem:[%s5075_s25 + $0x28] sm:$0xff]  ;;  %v293_v1 = vld [vmem:[%s5075_s25 + $0x30] sm:$0xff]  ;;  %v294_v2 = vld [vmem:[%s5075_s25 + $0x38] sm:$0xff] }
  0x16   :  { %v3822_v0 = vpack.c.bf16 %v292_v62, %v291_v61  ;;  %v3826_v3 = vpack.c.bf16 %v294_v2, %v293_v1  ;;  %v4408_v4 = vld [vmem:[%s5049_s0] sm:$0xff]  ;;  %v4415_v5 = vld [vmem:[%s5049_s0 + $0x8] sm:$0xff]  ;;  %v4422_v6 = vld [vmem:[%s5049_s0 + $0x10] sm:$0xff] }
  0x17   :  { %3809 = vmatpush1.bf16.msra.mxu1 %v3808_v35  ;;  %v4429_v7 = vld [vmem:[%s5049_s0 + $0x18] sm:$0xff]  ;;  %v4436_v8 = vld [vmem:[%s5050_s2] sm:$0xff]   ;;  %v4459_v27 = vld [vmem:[%s5050_s2 + $0x8] sm:$0xff]  }
  0x18   :  { %3781 = vmatpush3.bf16.msra.mxu0 %v3778_v24  ;;  %3811 = vmatprep.subr.bf16.mxu1 %v3810_v46  ;;  %v4441_v9 = vld [vmem:[%s5051_s3] sm:$0xff]   ;;  %v4464_v28 = vld [vmem:[%s5051_s3 + $0x8] sm:$0xff]  }
  0x19   :  { %3783 = vmatprep.subr.bf16.mxu0 %v3782_v32  ;;  %v191_v13 = vld [vmem:[%s5052_s8] sm:$0x3] }
  0x1a   :  { %v196_v16 = vrot.slane %v191_v13, %v4447_v12  ;;  %v200_v18 = vrot.slane %v191_v13, %v4452_v14  ;;  %v3152_v34 = vld [vmem:[%s5053_s10] ss:$0 sm:$0xff] }
  0x1b   :  { %3813 = vmatpush1.bf16.msra.mxu1 %v3812_v49 }
  0x1c   :  { %3785 = vmatpush3.bf16.msra.mxu0 %v3782_v32  ;;  %3815 = vmatprep.subr.bf16.mxu1 %v3814_v53 }
  0x1d   :  { %3787 = vmatprep.subr.bf16.mxu0 %v3786_v36 }
  0x20   :  { %3789 = vmatpush3.bf16.msra.mxu0 %v3786_v36 }
  0x21   :  { %3791 = vmatprep.subr.bf16.mxu0 %v3790_v39 }
  0x24   :  { %3793 = vmatpush3.bf16.msra.mxu0 %v3790_v39 }
  0x25   :  { %3795 = vmatprep.subr.bf16.mxu0 %v3794_v42 }
  0x28   :  { %3797 = vmatpush3.bf16.msra.mxu0 %v3794_v42 }
  0x2b   :  { %3469 = vmatmul.mubr.f32.vlgmr.msra.gmra.mrb[0].mxu0 %v76_v43 }
  0x2c   :  { %3501 = vmatprep.mubr.msk.bf16.mxu0 %vm411_vm1, %v4436_v8 }
  0xfe   :  { %v3470_v57 = vpop.f32.mrb[0].mxu0 }
  0xff   :  { %v166_v58 = vpop.f32.mrb[1].mxu0  ;;  %v4395_v63 = vadd.f32 %v3470_v57, %v3149_v54 }
 0x100   :  { %v4384_v59 = vadd.f32 %v3149_v54, %v166_v58 }
 0x102   :  { %3150 = vmatmul.mubr.msk.f32.vlgmr.msra.gmra.mrb[0].mxu1 %vm203_vm0, %v4384_v59 }
 0x103   :  { %280 = vmatprep.mubr.f32.mxu1 %v4161_v50  ;;  %3817 = vmatpush3.bf16.msra.mxu1 %v3814_v53 }
 0x104   :  { %3819 = vmatprep.subr.bf16.mxu1 %v3818_v60 }
 0x106   :  { %3151 = vmatmul.mubr.msk.f32.gmra.mrb[2].mxu1 %vm203_vm0, %v4395_v63 }
 0x107   :  { %3821 = vmatpush3.bf16.msra.mxu1 %v3818_v60  ;;  %3487 = vmatprep.mubr.msk.f32.mxu1 %vm203_vm0, %v4408_v4 }
 0x108   :  { %3823 = vmatprep.subr.bf16.mxu1 %v3822_v0 }
 0x10b   :  { %3825 = vmatpush3.bf16.msra.mxu1 %v3822_v0  ;;  %v4164_v0 = vmov 1.0  }
 0x10c   :  { %3827 = vmatprep.subr.bf16.mxu1 %v3826_v3 }
 0x10f   :  { %3829 = vmatpush3.bf16.msra.mxu1 %v3826_v3 }
 0x112   :  { %3488 = vmatmul.mubr.msk.f32.vlgmr.msra.gmra.mrb[4].mxu1 %vm203_vm0, %v4415_v5 }
 0x113   :  { %3490 = vmatprep.mubr.msk.f32.mxu1 %vm203_vm0, %v4422_v6 }
 0x116   :  { %3491 = vmatmul.mubr.msk.f32.gmra.mrb[6].mxu1 %vm203_vm0, %v4429_v7 }
 0x117   :  { %3495 = vmatprep.mubr.msk.bf16.mxu1 %vm411_vm1, %v4441_v9 }
 0x1d5   :  { %v276_v15 = vpop.f32.mrb[0].mxu1 }
 0x1d6   :  { %v278_v17 = vpop.f32.mrb[1].mxu1  ;;  %v277_v20 = vadd.f32 %v276_v15, %v196_v16 }
 0x1d7   :  { %v279_v23 = vadd.f32 %v278_v17, %v200_v18 }
 0x1d9   :  { %v282_v19 = vpop.f32.mrb[2].mxu1 }
 0x1da   :  { %v283_v21 = vadd.f32 %v282_v19, %v196_v16  ;;  %v284_v22 = vpop.f32.mrb[3].mxu1 }
 0x1db   :  { %v285_v24 = vadd.f32 %v284_v22, %v200_v18 }
 0x1dc   :  { %v399_v25 = vpack.c.bf16 %v283_v21, %v277_v20 }
 0x1dd   :  { %v400_v26 = vpack.c.bf16 %v285_v24, %v279_v23 }
 0x1de   :  { %3499 = vmatprep.subr.bf16.mxu0 %v399_v25 }
 0x1df   :  { %3493 = vmatprep.subr.bf16.mxu1 %v400_v26  ;;  %3500 = vmatpush3.bf16.msra.mxu0 %v399_v25 }
 0x1e0   :  { %3494 = vmatpush3.bf16.msra.mxu1 %v400_v26  ;;  %3527 = vmatprep.subr.bf16.mxu0 %v4161_v50 }
 0x1e1   :  { %3830 = vmatprep.subr.bf16.mxu1 %v4162_v33 }
 0x1e2   :  { %3502 = vmatmul.mubr.msk.bf16.vlgmr.msra.gmra.mrb[4].mxu0 %vm411_vm1, %v4459_v27 }
 0x1e3   :  { %3496 = vmatmul.mubr.msk.bf16.vlgmr.msra.gmra.mrb[8].mxu1 %vm411_vm1, %v4464_v28  ;;  %3531 = vmatprep.mubr.msk.bf16.mxu0 %vm4163_vm2, %v4161_v50 }
 0x1e4   :  { %3513 = vmatprep.mubr.msk.f32.mxu1 %vm4163_vm2, %v4161_v50 }
 0x1e5   :  { %v3489_v29 = vpop.f32.mrb[4].mxu1 }
 0x1e6   :  { %v380_v30 = vpop.f32.mrb[5].mxu1  ;;  %v386_v51 = vadd.f32 %v3489_v29, %v3152_v34  ;;  %v3167_v29 = vld [vmem:[%s5054_s11] ss:$0 sm:$0xff] }
 0x1e7   :  { %v381_v42 = vadd.f32 %v3152_v34, %v380_v30 }
 0x1e9   :  { %v3492_v31 = vpop.f32.mrb[6].mxu1 }
 0x1ea   :  { %v390_v32 = vpop.f32.mrb[7].mxu1  ;;  %v396_v46 = vadd.f32 %v3492_v31, %v3152_v34 }
 0x1eb   :  { %v391_v38 = vadd.f32 %v3152_v34, %v390_v32 }
 0x2b5   :  { %v3503_v35 = vpop.f32.mrb[4].mxu0 }
 0x2b6   :  { %v3497_v36 = vpop.f32.mrb[8].mxu1  ;;  %v517_v37 = vpop.f32.mrb[5].mxu0 }
 0x2b7   :  { %v526_v39 = vadd.f32 %v3503_v35, %v3497_v36  ;;  %v452_v40 = vpop.f32.mrb[9].mxu1  ;;  %v3504_v41 = vpop.f32.mrb[6].mxu0  ;;  %v3168_v35 = vld [vmem:[%s5055_s12] ss:$0 sm:$0xff] }
 0x2b8   :  { %v518_v43 = vadd.f32 %v517_v37, %v452_v40  ;;  %v3498_v44 = vpop.f32.mrb[10].mxu1  ;;  %v520_v45 = vpop.f32.mrb[7].mxu0 }
 0x2b9   :  { %v534_v47 = vadd.f32 %v526_v39, %v391_v38  ;;  %v529_v48 = vadd.f32 %v3504_v41, %v3498_v44  ;;  %v455_v49 = vpop.f32.mrb[11].mxu1 }
 0x2ba   :  { %v532_v52 = vadd.f32 %v518_v43, %v381_v42  ;;  %v521_v53 = vadd.f32 %v520_v45, %v455_v49 }
 0x2bb   :  { %v535_v54 = vadd.f32 %v529_v48, %v396_v46  ;;  %v614_v1 = vmul.f32 %v534_v47, %v534_v47 }
 0x2bc   :  { %v533_v55 = vadd.f32 %v521_v53, %v386_v51  ;;  %v612_v60 = vmul.f32 %v532_v52, %v532_v52 }
 0x2bd   :  { %v3834_v57 = vpack.c.bf16 %v535_v54, %v534_v47  ;;  %v615_v61 = vmul.f32 %v535_v54, %v535_v54 }
 0x2be   :  { %v3831_v56 = vpack.c.bf16 %v533_v55, %v532_v52  ;;  %v613_v58 = vmul.f32 %v533_v55, %v533_v55 }
 0x2bf   :  { %v3840_v2 = vpack.c.bf16 %v615_v61, %v614_v1 }
 0x2c0   :  { %3832 = vmatpush3.bf16.msra.mxu1 %v3831_v56  ;;  %v3837_v62 = vpack.c.bf16 %v613_v58, %v612_v60 }
 0x2c1   :  { %3833 = vmatprep.subr.bf16.mxu1 %v4162_v33 }
 0x2c4   :  { %3835 = vmatpush3.bf16.msra.mxu1 %v3834_v57 }
 0x2c5   :  { %3836 = vmatprep.subr.bf16.mxu1 %v4162_v33 }
 0x2c7   :  { %3514 = vmatmul.mubr.msk.f32.vlgmr.msra.gmra.mrb[12].mxu1 %vm538_vm3, %v4164_v0 }
 0x2c8   :  { %3838 = vmatpush3.bf16.msra.mxu1 %v3837_v62  ;;  %3524 = vmatprep.mubr.msk.f32.mxu1 %vm4163_vm2, %v4161_v50 }
 0x2c9   :  { %3839 = vmatprep.subr.bf16.mxu1 %v4162_v33 }
 0x2cc   :  { %3841 = vmatpush3.bf16.msra.mxu1 %v3840_v2 }
 0x2cd   :  { %3842 = vmatprep.subr.bf16.mxu1 %v4162_v33 }
 0x2cf   :  { %3525 = vmatmul.mubr.msk.f32.vlgmr.msra.gmra.mrb[14].mxu1 %vm538_vm3, %v4164_v0 }
 0x2d0   :  { %3539 = vmatprep.mubr.msk.f32.mxu1 %vm4163_vm2, %v4161_v50 }
 0x39a   :  { %v608_v3 = vpop.f32.mrb[12].mxu1 }
 0x39b   :  { %v3515_v10 = vpop.f32.mrb[13].mxu1  ;;  %v686_v11 = vmul.f32 0.03125, %v608_v3 }
 0x39d   :  { %v688_v15 = vmul.f32 %v686_v11, %v686_v11  ;;  %v693_v20 = vrot.slane %v686_v11, %v4447_v12 }
 0x39f   :  { %v694_v22 = vsub.f32 %v532_v52, %v693_v20  ;;  %v695_v23 = vsub.f32 %v533_v55, %v693_v20  ;;  %v696_v24 = vsub.f32 %v534_v47, %v693_v20  ;;  %v697_v25 = vsub.f32 %v535_v54, %v693_v20 }
 0x3a2   :  { %v682_v13 = vpop.f32.mrb[14].mxu1 }
 0x3a3   :  { %v687_v16 = vmul.f32 0.03125, %v682_v13  ;;  %v3526_v17 = vpop.f32.mrb[15].mxu1 }
 0x3a5   :  { %v689_v18 = vsub.f32 %v687_v16, %v688_v15 }
 0x3a7   :  { %v698_v19 = vadd.f32 1e-05, %v689_v18 }
 0x3a9   :  { %4009 = vrsqrt.f32 %v698_v19 }
 0x3b3   :  { %v4010_v21 = vpop.eup %4009 }
 0x3b4   :  { %v703_v26 = vrot.slane %v4010_v21, %v4447_v12 }
 0x3b6   :  { %v706_v30 = vmul.f32 %v703_v26, %v696_v24  ;;  %v704_v31 = vmul.f32 %v703_v26, %v694_v22  ;;  %v707_v32 = vmul.f32 %v703_v26, %v697_v25  ;;  %v705_v34 = vmul.f32 %v703_v26, %v695_v23 }
 0x3b8   :  { %v716_v36 = vmul.f32 %v3167_v29, %v706_v30  ;;  %v714_v37 = vmul.f32 %v3167_v29, %v704_v31  ;;  %v717_v38 = vmul.f32 %v3167_v29, %v707_v32  ;;  %v715_v39 = vmul.f32 %v3167_v29, %v705_v34 }
 0x3ba   :  { %v4499_v40 = vadd.f32 %v3168_v35, %v716_v36  ;;  %v4501_v41 = vadd.f32 %v3168_v35, %v714_v37  ;;  %v4503_v42 = vadd.f32 %v3168_v35, %v717_v38  ;;  %v4505_v43 = vadd.f32 %v3168_v35, %v715_v39 }
 0x3bc   :  { %v758_v44 = vand.u32 2147483647, %v4499_v40  ;;  %v756_v45 = vand.u32 2147483647, %v4501_v41  ;;  %v759_v47 = vand.u32 2147483647, %v4503_v42 }
 0x3bd   :  { %v757_v49 = vand.u32 2147483647, %v4505_v43  ;;  %v754_v22 = vmax.f32 %v4499_v40, 0.0  ;;  %v752_v29 = vmax.f32 %v4501_v41, 0.0 }
 0x3be   :  { %v762_v46 = vsub.f32 0.0, %v758_v44  ;;  %v760_v48 = vsub.f32 0.0, %v756_v45  ;;  %v763_v52 = vsub.f32 0.0, %v759_v47 }
 0x3bf   :  { %v761_v54 = vsub.f32 0.0, %v757_v49 }
 0x3c0   :  { %v768_v51 = vmul.f32 1.442695, %v762_v46  ;;  %v764_v53 = vmul.f32 1.442695, %v760_v48  ;;  %v770_v55 = vmul.f32 1.442695, %v763_v52 }
 0x3c1   :  { %v766_v56 = vmul.f32 1.442695, %v761_v54  ;;  %v753_v52 = vmax.f32 %v4505_v43, 0.0 }
 0x3c2   :  { %4011 = vpow2.f32 %v768_v51  ;;  %v755_v51 = vmax.f32 %v4503_v42, 0.0 }
 0x3c3   :  { %4013 = vpow2.f32 %v764_v53 }
 0x3c4   :  { %4015 = vpow2.f32 %v770_v55 }
 0x3c5   :  { %4017 = vpow2.f32 %v766_v56  ;;  %v730_v56 = vsub.f32 0.0, %v4499_v40 }
 0x3cc   :  { %v4012_v57 = vpop.eup %4011 }
 0x3cd   :  { %v4014_v58 = vpop.eup %4013  ;;  %v790_v60 = vadd.f32 1.0, %v4012_v57  ;;  %v793_v10 = vmul.f32 -0.5, %v4012_v57  ;;  %v796_v17 = vand.u32 2147483647, %v4012_v57 }
 0x3ce   :  { %v4016_v61 = vpop.eup %4015  ;;  %v772_v62 = vadd.f32 1.0, %v4014_v58  ;;  %v775_v11 = vmul.f32 -0.5, %v4014_v58  ;;  %v778_v19 = vand.u32 2147483647, %v4014_v58 }
 0x3cf   :  { %v4018_v1 = vpop.eup %4017  ;;  %4019 = vlog2.f32 %v790_v60  ;;  %v799_v2 = vadd.f32 1.0, %v4016_v61  ;;  %v802_v13 = vmul.f32 -0.5, %v4016_v61  ;;  %v794_v15 = vadd.f32 1.0, %v793_v10 }
 0x3d0   :  { %4021 = vlog2.f32 %v772_v62  ;;  %v781_v3 = vadd.f32 1.0, %v4018_v1  ;;  %v784_v16 = vmul.f32 -0.5, %v4018_v1  ;;  %v776_v18 = vadd.f32 1.0, %v775_v11 }
 0x3d1   :  { %4023 = vlog2.f32 %v799_v2  ;;  %v803_v20 = vadd.f32 1.0, %v802_v13  ;;  %v805_v23 = vand.u32 2147483647, %v4016_v61  ;;  %v795_v26 = vmul.f32 %v4012_v57, %v794_v15 }
 0x3d2   :  { %4025 = vlog2.f32 %v781_v3  ;;  %v785_v30 = vadd.f32 1.0, %v784_v16  ;;  %vm797_vm4 = vcmp.lt.f32.partialorder %v796_v17, 0.0004427343  ;;  %v777_v34 = vmul.f32 %v4014_v58, %v776_v18 }
 0x3d3   :  { %v787_v35 = vand.u32 2147483647, %v4018_v1  ;;  %vm779_vm5 = vcmp.lt.f32.partialorder %v778_v19, 0.0004427343  ;;  %v804_v38 = vmul.f32 %v4016_v61, %v803_v20  ;;  %vm806_vm6 = vcmp.lt.f32.partialorder %v805_v23, 0.0004427343 }
 0x3d4   :  { %v786_v49 = vmul.f32 %v4018_v1, %v785_v30  ;;  %v728_v57 = vsub.f32 0.0, %v4501_v41  ;;  %v731_v58 = vsub.f32 0.0, %v4503_v42  ;;  %v729_v60 = vsub.f32 0.0, %v4505_v43 }
 0x3d5   :  { %vm788_vm7 = vcmp.lt.f32.partialorder %v787_v35, 0.0004427343  ;;  %v736_v61 = vmul.f32 1.442695, %v730_v56  ;;  %v3183_v56 = vld [vmem:[%s5074_s24 + $0xc8] sm:$0xff] }
 0x3d6   :  { %v732_v62 = vmul.f32 1.442695, %v728_v57  ;;  %v738_v1 = vmul.f32 1.442695, %v731_v58  ;;  %v734_v2 = vmul.f32 1.442695, %v729_v60 }
 0x3d7   :  { %4027 = vpow2.f32 %v736_v61  ;;  %v3185_v57 = vld [vmem:[%s5074_s24 + $0xd8] sm:$0xff]  ;;  %v3182_v61 = vld [vmem:[%s5074_s24 + $0xc0] sm:$0xff] }
 0x3d8   :  { %4029 = vpow2.f32 %v732_v62  ;;  %v3856_v60 = vpack.c.bf16 %v3185_v57, %v3183_v56  ;;  %v3184_v62 = vld [vmem:[%s5074_s24 + $0xd0] sm:$0xff] }
 0x3d9   :  { %v4020_v21 = vpop.eup %4019  ;;  %4031 = vpow2.f32 %v738_v1  ;;  %v3187_v1 = vld [vmem:[%s5074_s24 + $0xe8] sm:$0xff] }
 0x3da   :  { %v4022_v24 = vpop.eup %4021  ;;  %v792_v25 = vmul.f32 0.6931472, %v4020_v21  ;;  %4033 = vpow2.f32 %v734_v2  ;;  %v3189_v2 = vld [vmem:[%s5074_s24 + $0xf8] sm:$0xff] }
 0x3db   :  { %v4024_v31 = vpop.eup %4023  ;;  %v774_v32 = vmul.f32 0.6931472, %v4022_v24 }
 0x3dc   :  { %v798_v36 = vsel %vm797_vm4, %v795_v26, %v792_v25  ;;  %v801_v37 = vmul.f32 0.6931472, %v4024_v31  ;;  %v4026_v39 = vpop.eup %4025 }
 0x3dd   :  { %v810_v44 = vadd.f32 %v798_v36, %v754_v22  ;;  %v780_v45 = vsel %vm779_vm5, %v777_v34, %v774_v32  ;;  %v783_v48 = vmul.f32 0.6931472, %v4026_v39 }
 0x3de   :  { %v808_v46 = vadd.f32 %v780_v45, %v752_v29  ;;  %v807_v47 = vsel %vm806_vm6, %v804_v38, %v801_v37  ;;  %v3175_v45 = vld [vmem:[%s5074_s24 + $0x88] sm:$0xff] }
 0x3df   :  { %820 = vrot.lane.b32.xlu1 %v810_v44, %s4165_s22  ;;  %v789_v53 = vsel %vm788_vm7, %v786_v49, %v783_v48  ;;  %v811_v54 = vadd.f32 %v807_v47, %v755_v51  ;;  %v3174_v47 = vld [vmem:[%s5074_s24 + $0x80] sm:$0xff]  ;;  %v3176_v49 = vld [vmem:[%s5074_s24 + $0x90] sm:$0xff]  ;;  %v3181_v51 = vld [vmem:[%s5074_s24 + $0xb8] sm:$0xff] }
 0x3e0   :  { %816 = vrot.lane.b32.xlu0 %v808_v46, %s4165_s22  ;;  %v809_v55 = vadd.f32 %v789_v53, %v753_v52  ;;  %v3177_v46 = vld [vmem:[%s5074_s24 + $0x98] sm:$0xff]  ;;  %v3850_v52 = vpack.c.bf16 %v3176_v49, %v3174_v47 }
 0x3e1   :  { %v4028_v3 = vpop.eup %4027  ;;  %v3848_v48 = vpack.c.bf16 %v3177_v46, %v3175_v45 }
 0x3e2   :  { %v4030_v10 = vpop.eup %4029  ;;  %v742_v15 = vadd.f32 1.0, %v4028_v3  ;;  %v3858_v3 = vpack.c.bf16 %v3184_v62, %v3182_v61 }
 0x3e3   :  { %822 = vrot.lane.b32.xlu1 %v811_v54, %s4165_s22  ;;  %v4032_v11 = vpop.eup %4031  ;;  %v740_v40 = vadd.f32 1.0, %v4030_v10  ;;  %v3178_v54 = vld [vmem:[%s5074_s24 + $0xa0] sm:$0xff]  ;;  %v3860_v10 = vpack.c.bf16 %v3189_v2, %v3187_v1 }
 0x3e4   :  { %818 = vrot.lane.b32.xlu0 %v809_v55, %s4165_s22  ;;  %v4034_v13 = vpop.eup %4033  ;;  %v743_v16 = vadd.f32 1.0, %v4032_v11  ;;  %4035 = vrcp.f32 %v742_v15  ;;  %v3180_v55 = vld [vmem:[%s5074_s24 + $0xb0] sm:$0xff]  ;;  %v3186_v11 = vld [vmem:[%s5074_s24 + $0xe0] sm:$0xff] }
 0x3e5   :  { %v741_v41 = vadd.f32 1.0, %v4034_v13  ;;  %4037 = vrcp.f32 %v740_v40  ;;  %v3854_v58 = vpack.c.bf16 %v3180_v55, %v3178_v54  ;;  %v3188_v13 = vld [vmem:[%s5074_s24 + $0xf0] sm:$0xff] }
 0x3e6   :  { %4039 = vrcp.f32 %v743_v16  ;;  %v3862_v15 = vpack.c.bf16 %v3188_v13, %v3186_v11 }
 0x3e7   :  { %4041 = vrcp.f32 %v741_v41 }
 0x3ee   :  { %v4036_v17 = vpop.eup %4035 }
 0x3ef   :  { %v4038_v18 = vpop.eup %4037 }
 0x3f0   :  { %v4040_v19 = vpop.eup %4039 }
 0x3f1   :  { %v4042_v21 = vpop.eup %4041 }
 0x402   :  { %836 = vxpose.xlu0.c.b16.start [1/2] (short) (narrow) %v4441_v9, 16 }
 0x406   :  { %837 = vxpose.xlu0.c.b16.end [2/2] (short) (narrow) %v4464_v28, 16 }
 0x451   :  { %v821_v42 = vpop.permute.xlu1 %820 }
 0x452   :  { %v817_v43 = vpop.permute.xlu0 %816  ;;  %v830_v22 = vmul.f32 %v4036_v17, %v821_v42 }
 0x453   :  { %v828_v25 = vmul.f32 %v4038_v18, %v817_v43 }
 0x455   :  { %v823_v20 = vpop.permute.xlu1 %822 }
 0x456   :  { %v831_v23 = vmul.f32 %v4040_v19, %v823_v20  ;;  %v819_v24 = vpop.permute.xlu0 %818 }
 0x457   :  { %v829_v26 = vmul.f32 %v4042_v21, %v819_v24 }
 0x458   :  { %v833_v29 = vpack.c.bf16 %v831_v23, %v830_v22 }
 0x459   :  { %v832_v30 = vpack.c.bf16 %v829_v26, %v828_v25  ;;  %v3172_v26 = vld [vmem:[%s5056_s13] ss:$0 sm:$0xff] }
 0x45b   :  { %3528 = vmatpush3.bf16.msra.mxu0 %v832_v30 }
 0x45c   :  { %3529 = vmatprep.subr.bf16.mxu0 %v4161_v50 }
 0x45f   :  { %3530 = vmatpush3.bf16.msra.mxu0 %v833_v29 }
 0x460   :  { %3849 = vmatprep.subr.bf16.mxu0 %v3848_v48 }
 0x468   :  { %v4526_v31 = vpop.trf.xlu0 }
 0x469   :  { %3532 = vmatmul.mubr.msk.bf16.vlgmr.msra.gmra.mrb[8].mxu0 %vm538_vm3, %v4526_v31 }
 0x46a   :  { %1208 = vmatprep.mubr.f32.mxu0 %v4161_v50  ;;  %3851 = vmatpush1.bf16.msra.mxu0 %v3850_v52 }
 0x53c   :  { %v4531_v32 = vpop.f32.mrb[8].mxu0 }
 0x53d   :  { %v3533_v34 = vpop.f32.mrb[9].mxu0  ;;  %v970_v36 = vmul.f32 %v4531_v32, %v4531_v32 }
 0x53e   :  { %v4533_v35 = vpop.f32.mrb[10].mxu0 }
 0x53f   :  { %v3843_v37 = vpack.c.bf16 %v4533_v35, %v4531_v32  ;;  %v971_v38 = vmul.f32 %v4533_v35, %v4533_v35  ;;  %v3534_v39 = vpop.f32.mrb[11].mxu0 }
 0x541   :  { %v3846_v44 = vpack.c.bf16 %v971_v38, %v970_v36  ;;  %3844 = vmatpush3.bf16.msra.mxu1 %v3843_v37 }
 0x542   :  { %3845 = vmatprep.subr.bf16.mxu1 %v4162_v33 }
 0x544   :  { %3540 = vmatmul.mubr.msk.f32.vlgmr.msra.gmra.mrb[16].mxu1 %vm411_vm1, %v4164_v0 }
 0x545   :  { %3847 = vmatpush3.bf16.msra.mxu1 %v3846_v44  ;;  %3546 = vmatprep.mubr.msk.f32.mxu1 %vm4163_vm2, %v4161_v50 }
 0x548   :  { %3547 = vmatmul.mubr.msk.f32.vlgmr.msra.gmra.mrb[18].mxu1 %vm411_vm1, %v4164_v0 }
 0x549   :  { %3565 = vmatprep.mubr.msk.f32.mxu1 %vm203_vm0, %v4408_v4  ;;  %v3179_v4 = vld [vmem:[%s5074_s24 + $0xa8] sm:$0xff] }
 0x54a   :  { %v3852_v53 = vpack.c.bf16 %v3181_v51, %v3179_v4 }
 0x54c   :  { %3853 = vmatprep.subr.bf16.mxu0 %v3852_v53 }
 0x54d   :  { %3855 = vmatpush1.bf16.msra.mxu0 %v3854_v58 }
 0x54e   :  { %3857 = vmatprep.subr.bf16.mxu0 %v3856_v60 }
 0x551   :  { %3859 = vmatpush1.bf16.msra.mxu0 %v3858_v3 }
 0x552   :  { %3861 = vmatprep.subr.bf16.mxu0 %v3860_v10 }
 0x555   :  { %3863 = vmatpush1.bf16.msra.mxu0 %v3862_v15 }
 0x617   :  { %v966_v40 = vpop.f32.mrb[16].mxu1 }
 0x618   :  { %v1042_v16 = vmul.f32 0.0625, %v966_v40  ;;  %v3541_v41 = vpop.f32.mrb[17].mxu1 }
 0x619   :  { %v3194_v41 = vld [vmem:[%s5075_s25 + $0x48] sm:$0xff] }
 0x61a   :  { %v1049_v42 = vrot.slane %v1042_v16, %v4447_v12  ;;  %v1044_v17 = vmul.f32 %v1042_v16, %v1042_v16  ;;  %v3193_v16 = vld [vmem:[%s5075_s25 + $0x40] sm:$0xff] }
 0x61b   :  { %v1038_v43 = vpop.f32.mrb[18].mxu1 }
 0x61c   :  { %v1050_v18 = vsub.f32 %v4531_v32, %v1049_v42  ;;  %v1051_v19 = vsub.f32 %v4533_v35, %v1049_v42  ;;  %v1043_v20 = vmul.f32 0.0625, %v1038_v43  ;;  %v3548_v21 = vpop.f32.mrb[19].mxu1  ;;  %v3173_v32 = vld [vmem:[%s5057_s14] ss:$0 sm:$0xff]  ;;  %v3864_v42 = vpack.c.bf16 %v3194_v41, %v3193_v16  ;;  %v3195_v43 = vld [vmem:[%s5075_s25 + $0x50] sm:$0xff] }
 0x61d   :  { %v3199_v21 = vld [vmem:[%s5075_s25 + $0x70] sm:$0xff] }
 0x61e   :  { %v1045_v22 = vsub.f32 %v1043_v20, %v1044_v17  ;;  %3865 = vmatprep.subr.bf16.mxu1 %v3864_v42  ;;  %v3196_v17 = vld [vmem:[%s5075_s25 + $0x58] sm:$0xff] }
 0x61f   :  { %3867 = vmatpush3.bf16.msra.mxu1 %v3864_v42 }
 0x620   :  { %v1052_v23 = vadd.f32 1e-05, %v1045_v22  ;;  %v3200_v22 = vld [vmem:[%s5075_s25 + $0x78] sm:$0xff] }
 0x622   :  { %4043 = vrsqrt.f32 %v1052_v23  ;;  %v3876_v23 = vpack.c.bf16 %v3200_v22, %v3199_v21  ;;  %v3215_v22 = vld [vmem:[%s5054_s11 + $0x1] ss:$0 sm:$0xff] }
 0x62c   :  { %v4044_v24 = vpop.eup %4043 }
 0x62d   :  { %v1057_v25 = vrot.slane %v4044_v24, %v4447_v12  ;;  %v3190_v24 = vld [vmem:[%s5052_s8 + $0x2] sm:$0x3] }
 0x62f   :  { %v1058_v29 = vmul.f32 %v1057_v25, %v1050_v18  ;;  %v1059_v30 = vmul.f32 %v1057_v25, %v1051_v19  ;;  %v3197_v18 = vld [vmem:[%s5075_s25 + $0x60] sm:$0xff]  ;;  %v3198_v19 = vld [vmem:[%s5075_s25 + $0x68] sm:$0xff] }
 0x630   :  { %v3872_v20 = vpack.c.bf16 %v3198_v19, %v3197_v18 }
 0x631   :  { %v1066_v34 = vmul.f32 %v3172_v26, %v1058_v29  ;;  %v1067_v35 = vmul.f32 %v3172_v26, %v1059_v30  ;;  %v1131_v26 = vrot.slane %v3190_v24, %v4447_v12  ;;  %v1135_v30 = vrot.slane %v3190_v24, %v4452_v14 }
 0x633   :  { %v1074_v36 = vadd.f32 %v3173_v32, %v1066_v34  ;;  %v1075_v37 = vadd.f32 %v3173_v32, %v1067_v35 }
 0x635   :  { %v1076_v38 = vadd.f32 %v1074_v36, %v4384_v59  ;;  %v1077_v39 = vadd.f32 %v1075_v37, %v4395_v63 }
 0x637   :  { %v1080_v44 = vand.u32 2147483647, %v1076_v38  ;;  %v1081_v45 = vand.u32 2147483647, %v1077_v39  ;;  %v1078_v1 = vmax.f32 %v1076_v38, 0.0  ;;  %v1079_v15 = vmax.f32 %v1077_v39, 0.0 }
 0x639   :  { %v1082_v46 = vsub.f32 0.0, %v1080_v44  ;;  %v1083_v47 = vsub.f32 0.0, %v1081_v45 }
 0x63b   :  { %v1084_v48 = vmul.f32 1.442695, %v1082_v46  ;;  %v1086_v49 = vmul.f32 1.442695, %v1083_v47 }
 0x63d   :  { %4045 = vpow2.f32 %v1084_v48 }
 0x63e   :  { %4047 = vpow2.f32 %v1086_v49 }
 0x647   :  { %v4046_v4 = vpop.eup %4045 }
 0x648   :  { %v4048_v51 = vpop.eup %4047  ;;  %v1088_v52 = vadd.f32 1.0, %v4046_v4  ;;  %v1091_v54 = vmul.f32 -0.5, %v4046_v4  ;;  %v1094_v59 = vand.u32 2147483647, %v4046_v4 }
 0x649   :  { %v1097_v53 = vadd.f32 1.0, %v4048_v51  ;;  %v1100_v55 = vmul.f32 -0.5, %v4048_v51  ;;  %v1103_v58 = vand.u32 2147483647, %v4048_v51 }
 0x64a   :  { %4049 = vlog2.f32 %v1088_v52  ;;  %v1092_v56 = vadd.f32 1.0, %v1091_v54  ;;  %vm1095_vm8 = vcmp.lt.f32.partialorder %v1094_v59, 0.0004427343 }
 0x64b   :  { %4051 = vlog2.f32 %v1097_v53  ;;  %v1101_v57 = vadd.f32 1.0, %v1100_v55  ;;  %vm1104_vm9 = vcmp.lt.f32.partialorder %v1103_v58, 0.0004427343 }
 0x64c   :  { %v1093_v62 = vmul.f32 %v4046_v4, %v1092_v56 }
 0x64d   :  { %v1102_v10 = vmul.f32 %v4048_v51, %v1101_v57 }
 0x654   :  { %v4050_v63 = vpop.eup %4049 }
 0x655   :  { %v4052_v60 = vpop.eup %4051  ;;  %v1090_v61 = vmul.f32 0.6931472, %v4050_v63 }
 0x656   :  { %v1099_v2 = vmul.f32 0.6931472, %v4052_v60 }
 0x657   :  { %v1096_v3 = vsel %vm1095_vm8, %v1093_v62, %v1090_v61 }
 0x658   :  { %v4610_v11 = vadd.f32 %v1096_v3, %v1078_v1  ;;  %v1105_v13 = vsel %vm1104_vm9, %v1102_v10, %v1099_v2 }
 0x659   :  { %v4615_v40 = vadd.f32 %v1105_v13, %v1079_v15 }
 0x65a   :  { %3191 = vmatmul.mubr.msk.f32.vlgmr.msra.gmra.mrb[2].mxu0 %vm203_vm0, %v4610_v11 }
 0x65b   :  { %1214 = vmatprep.mubr.f32.mxu0 %v4161_v50 }
 0x65e   :  { %3192 = vmatmul.mubr.msk.f32.gmra.mrb[12].mxu0 %vm203_vm0, %v4615_v40 }
 0x65f   :  { %3573 = vmatprep.mubr.msk.bf16.mxu0 %vm411_vm1, %v4441_v9  ;;  %v3868_v9 = vpack.c.bf16 %v3196_v17, %v3195_v43 }
 0x661   :  { %3869 = vmatprep.subr.bf16.mxu1 %v3868_v9 }
 0x662   :  { %3871 = vmatpush3.bf16.msra.mxu1 %v3868_v9 }
 0x663   :  { %3873 = vmatprep.subr.bf16.mxu1 %v3872_v20 }
 0x666   :  { %3875 = vmatpush3.bf16.msra.mxu1 %v3872_v20 }
 0x667   :  { %3877 = vmatprep.subr.bf16.mxu1 %v3876_v23 }
 0x66a   :  { %3879 = vmatpush3.bf16.msra.mxu1 %v3876_v23 }
 0x66b   :  { %3880 = vmatprep.subr.bf16.mxu1 %v4162_v33 }
 0x66d   :  { %3566 = vmatmul.mubr.msk.f32.vlgmr.msra.gmra.mrb[20].mxu1 %vm203_vm0, %v4415_v5 }
 0x66e   :  { %3568 = vmatprep.mubr.msk.f32.mxu1 %vm203_vm0, %v4422_v6 }
 0x671   :  { %3569 = vmatmul.mubr.msk.f32.gmra.mrb[22].mxu1 %vm203_vm0, %v4429_v7 }
 0x672   :  { %3591 = vmatprep.mubr.msk.f32.mxu1 %vm4163_vm2, %v4161_v50 }
 0x72d   :  { %v1210_v25 = vpop.f32.mrb[2].mxu0 }
 0x72e   :  { %v1212_v29 = vpop.f32.mrb[3].mxu0  ;;  %v1211_v32 = vadd.f32 %v1210_v25, %v1131_v26 }
 0x72f   :  { %v1213_v35 = vadd.f32 %v1212_v29, %v1135_v30  ;;  %v3216_v29 = vld [vmem:[%s5055_s12 + $0x1] ss:$0 sm:$0xff] }
 0x731   :  { %v1216_v5 = vpop.f32.mrb[12].mxu0 }
 0x732   :  { %v1217_v34 = vadd.f32 %v1216_v5, %v1131_v26  ;;  %v1218_v6 = vpop.f32.mrb[13].mxu0 }
 0x733   :  { %v1219_v36 = vadd.f32 %v1218_v6, %v1135_v30 }
 0x734   :  { %v1323_v7 = vpack.c.bf16 %v1217_v34, %v1211_v32 }
 0x735   :  { %v1324_v37 = vpack.c.bf16 %v1219_v36, %v1213_v35 }
 0x737   :  { %3571 = vmatprep.subr.bf16.mxu0 %v1324_v37 }
 0x738   :  { %3572 = vmatpush3.bf16.msra.mxu0 %v1324_v37 }
 0x739   :  { %3577 = vmatprep.subr.bf16.mxu0 %v1323_v7 }
 0x73b   :  { %3574 = vmatmul.mubr.msk.bf16.vlgmr.msra.gmra.mrb[16].mxu0 %vm411_vm1, %v4464_v28  ;;  %v3202_v28 = vld [vmem:[%s5053_s10 + $0x1] ss:$0 sm:$0xff] }
 0x73c   :  { %3578 = vmatpush3.bf16.msra.mxu0 %v1323_v7  ;;  %3579 = vmatprep.mubr.msk.bf16.mxu0 %vm411_vm1, %v4436_v8 }
 0x73d   :  { %3605 = vmatprep.subr.bf16.mxu0 %v4161_v50 }
 0x740   :  { %v3567_v38 = vpop.f32.mrb[20].mxu1 }
 0x741   :  { %v1304_v39 = vpop.f32.mrb[21].mxu1  ;;  %v1310_v8 = vadd.f32 %v3567_v38, %v3202_v28 }
 0x742   :  { %v1305_v47 = vadd.f32 %v3202_v28, %v1304_v39 }
 0x744   :  { %v3570_v44 = vpop.f32.mrb[22].mxu1 }
 0x745   :  { %v1314_v45 = vpop.f32.mrb[23].mxu1  ;;  %v1320_v48 = vadd.f32 %v3570_v44, %v3202_v28 }
 0x746   :  { %v1315_v46 = vadd.f32 %v3202_v28, %v1314_v45 }
 0x747   :  { %3580 = vmatmul.mubr.msk.bf16.vlgmr.msra.gmra.mrb[16].mxu0 %vm411_vm1, %v4459_v27 }
 0x748   :  { %3609 = vmatprep.mubr.msk.bf16.mxu0 %vm4163_vm2, %v4161_v50 }
 0x81a   :  { %v3581_v49 = vpop.f32.mrb[16].mxu0 }
 0x81b   :  { %v1425_v4 = vadd.f32 %v3581_v49, %v1315_v46  ;;  %v1408_v51 = vpop.f32.mrb[17].mxu0 }
 0x81c   :  { %v1423_v52 = vadd.f32 %v1408_v51, %v1305_v47  ;;  %v3582_v27 = vpop.f32.mrb[18].mxu0 }
 0x81d   :  { %v1426_v53 = vadd.f32 %v3582_v27, %v1320_v48  ;;  %v1411_v54 = vpop.f32.mrb[19].mxu0  ;;  %v1503_v61 = vmul.f32 %v1425_v4, %v1425_v4 }
 0x81e   :  { %v1424_v55 = vadd.f32 %v1411_v54, %v1310_v8  ;;  %v1501_v63 = vmul.f32 %v1423_v52, %v1423_v52 }
 0x81f   :  { %v3884_v59 = vpack.c.bf16 %v1426_v53, %v1425_v4  ;;  %v1504_v58 = vmul.f32 %v1426_v53, %v1426_v53 }
 0x820   :  { %v3881_v56 = vpack.c.bf16 %v1424_v55, %v1423_v52  ;;  %v1502_v57 = vmul.f32 %v1424_v55, %v1424_v55 }
 0x821   :  { %v3890_v62 = vpack.c.bf16 %v1504_v58, %v1503_v61 }
 0x822   :  { %3882 = vmatpush3.bf16.msra.mxu1 %v3881_v56  ;;  %v3887_v60 = vpack.c.bf16 %v1502_v57, %v1501_v63 }
 0x823   :  { %3883 = vmatprep.subr.bf16.mxu1 %v4162_v33 }
 0x826   :  { %3885 = vmatpush3.bf16.msra.mxu1 %v3884_v59 }
 0x827   :  { %3886 = vmatprep.subr.bf16.mxu1 %v4162_v33 }
 0x829   :  { %3592 = vmatmul.mubr.msk.f32.vlgmr.msra.gmra.mrb[24].mxu1 %vm538_vm3, %v4164_v0 }
 0x82a   :  { %3888 = vmatpush3.bf16.msra.mxu1 %v3887_v60  ;;  %3602 = vmatprep.mubr.msk.f32.mxu1 %vm4163_vm2, %v4161_v50 }
 0x82b   :  { %3889 = vmatprep.subr.bf16.mxu1 %v4162_v33 }
 0x82e   :  { %3891 = vmatpush3.bf16.msra.mxu1 %v3890_v62 }
 0x82f   :  { %3892 = vmatprep.subr.bf16.mxu1 %v4162_v33 }
 0x831   :  { %3603 = vmatmul.mubr.msk.f32.vlgmr.msra.gmra.mrb[26].mxu1 %vm538_vm3, %v4164_v0 }
 0x832   :  { %3617 = vmatprep.mubr.msk.f32.mxu1 %vm4163_vm2, %v4161_v50 }
 0x8fc   :  { %v1497_v1 = vpop.f32.mrb[24].mxu1 }
 0x8fd   :  { %v3593_v2 = vpop.f32.mrb[25].mxu1  ;;  %v1575_v3 = vmul.f32 0.03125, %v1497_v1 }
 0x8ff   :  { %v1577_v13 = vmul.f32 %v1575_v3, %v1575_v3  ;;  %v1582_v43 = vrot.slane %v1575_v3, %v4447_v12 }
 0x901   :  { %v1583_v9 = vsub.f32 %v1423_v52, %v1582_v43  ;;  %v1584_v18 = vsub.f32 %v1424_v55, %v1582_v43  ;;  %v1585_v19 = vsub.f32 %v1425_v4, %v1582_v43  ;;  %v1586_v20 = vsub.f32 %v1426_v53, %v1582_v43 }
 0x904   :  { %v1571_v10 = vpop.f32.mrb[26].mxu1 }
 0x905   :  { %v1576_v15 = vmul.f32 0.03125, %v1571_v10  ;;  %v3604_v16 = vpop.f32.mrb[27].mxu1 }
 0x907   :  { %v1578_v41 = vsub.f32 %v1576_v15, %v1577_v13 }
 0x909   :  { %v1587_v42 = vadd.f32 1e-05, %v1578_v41 }
 0x90b   :  { %4053 = vrsqrt.f32 %v1587_v42 }
 0x915   :  { %v4054_v17 = vpop.eup %4053 }
 0x916   :  { %v1592_v21 = vrot.slane %v4054_v17, %v4447_v12 }
 0x918   :  { %v1593_v23 = vmul.f32 %v1592_v21, %v1583_v9  ;;  %v1594_v24 = vmul.f32 %v1592_v21, %v1584_v18  ;;  %v1595_v25 = vmul.f32 %v1592_v21, %v1585_v19  ;;  %v1596_v26 = vmul.f32 %v1592_v21, %v1586_v20 }
 0x91a   :  { %v1603_v30 = vmul.f32 %v3215_v22, %v1593_v23  ;;  %v1604_v5 = vmul.f32 %v3215_v22, %v1594_v24  ;;  %v1605_v32 = vmul.f32 %v3215_v22, %v1595_v25  ;;  %v1606_v34 = vmul.f32 %v3215_v22, %v1596_v26 }
 0x91c   :  { %v4691_v6 = vadd.f32 %v3216_v29, %v1603_v30  ;;  %v4693_v35 = vadd.f32 %v3216_v29, %v1604_v5  ;;  %v4695_v36 = vadd.f32 %v3216_v29, %v1605_v32  ;;  %v4697_v7 = vadd.f32 %v3216_v29, %v1606_v34 }
 0x91e   :  { %v1645_v37 = vand.u32 2147483647, %v4691_v6  ;;  %v1646_v38 = vand.u32 2147483647, %v4693_v35  ;;  %v1647_v44 = vand.u32 2147483647, %v4695_v36 }
 0x91f   :  { %v1648_v28 = vand.u32 2147483647, %v4697_v7  ;;  %v1641_v16 = vmax.f32 %v4691_v6, 0.0  ;;  %v1642_v23 = vmax.f32 %v4693_v35, 0.0  ;;  %v1643_v32 = vmax.f32 %v4695_v36, 0.0 }
 0x920   :  { %v1649_v39 = vsub.f32 0.0, %v1645_v37  ;;  %v1650_v45 = vsub.f32 0.0, %v1646_v38  ;;  %v1651_v47 = vsub.f32 0.0, %v1647_v44 }
 0x921   :  { %v1652_v8 = vsub.f32 0.0, %v1648_v28  ;;  %v1618_v28 = vsub.f32 0.0, %v4693_v35 }
 0x922   :  { %v1653_v46 = vmul.f32 1.442695, %v1649_v39  ;;  %v1655_v48 = vmul.f32 1.442695, %v1650_v45  ;;  %v1657_v49 = vmul.f32 1.442695, %v1651_v47 }
 0x923   :  { %v1659_v4 = vmul.f32 1.442695, %v1652_v8  ;;  %v1644_v39 = vmax.f32 %v4697_v7, 0.0  ;;  %v1617_v45 = vsub.f32 0.0, %v4691_v6  ;;  %v1623_v47 = vmul.f32 1.442695, %v1618_v28 }
 0x924   :  { %4055 = vpow2.f32 %v1653_v46  ;;  %v1620_v8 = vsub.f32 0.0, %v4697_v7  ;;  %v3239_v28 = vld [vmem:[%s5074_s24 + $0x178] sm:$0xff] }
 0x925   :  { %4057 = vpow2.f32 %v1655_v48  ;;  %v1621_v46 = vmul.f32 1.442695, %v1617_v45  ;;  %v1619_v48 = vsub.f32 0.0, %v4695_v36  ;;  %v3237_v45 = vld [vmem:[%s5074_s24 + $0x168] sm:$0xff] }
 0x926   :  { %4059 = vpow2.f32 %v1657_v49 }
 0x927   :  { %4061 = vpow2.f32 %v1659_v4  ;;  %v1625_v49 = vmul.f32 1.442695, %v1619_v48  ;;  %v1627_v4 = vmul.f32 1.442695, %v1620_v8  ;;  %v3236_v48 = vld [vmem:[%s5074_s24 + $0x160] sm:$0xff]  ;;  %v3238_v8 = vld [vmem:[%s5074_s24 + $0x170] sm:$0xff] }
 0x92e   :  { %v4056_v51 = vpop.eup %4055 }
 0x92f   :  { %v4058_v52 = vpop.eup %4057  ;;  %v1661_v27 = vadd.f32 1.0, %v4056_v51  ;;  %v1664_v57 = vmul.f32 -0.5, %v4056_v51  ;;  %v1667_v60 = vand.u32 2147483647, %v4056_v51 }
 0x930   :  { %v4060_v53 = vpop.eup %4059  ;;  %v1670_v54 = vadd.f32 1.0, %v4058_v52  ;;  %v1673_v63 = vmul.f32 -0.5, %v4058_v52  ;;  %v1676_v2 = vand.u32 2147483647, %v4058_v52 }
 0x931   :  { %v4062_v55 = vpop.eup %4061  ;;  %4063 = vlog2.f32 %v1661_v27  ;;  %v1679_v56 = vadd.f32 1.0, %v4060_v53  ;;  %v1665_v58 = vadd.f32 1.0, %v1664_v57  ;;  %v1682_v62 = vmul.f32 -0.5, %v4060_v53 }
 0x932   :  { %4065 = vlog2.f32 %v1670_v54  ;;  %v1688_v59 = vadd.f32 1.0, %v4062_v55  ;;  %v1674_v61 = vadd.f32 1.0, %v1673_v63  ;;  %vm1668_vm10 = vcmp.lt.f32.partialorder %v1667_v60, 0.0004427343 }
 0x933   :  { %4067 = vlog2.f32 %v1679_v56  ;;  %v1666_v13 = vmul.f32 %v4056_v51, %v1665_v58  ;;  %v1683_v17 = vadd.f32 1.0, %v1682_v62  ;;  %v1691_v9 = vmul.f32 -0.5, %v4062_v55 }
 0x934   :  { %4069 = vlog2.f32 %v1688_v59  ;;  %v1675_v43 = vmul.f32 %v4058_v52, %v1674_v61  ;;  %vm1677_vm11 = vcmp.lt.f32.partialorder %v1676_v2, 0.0004427343  ;;  %v1685_v19 = vand.u32 2147483647, %v4060_v53 }
 0x935   :  { %v1684_v24 = vmul.f32 %v4060_v53, %v1683_v17  ;;  %v1692_v25 = vadd.f32 1.0, %v1691_v9  ;;  %v1694_v29 = vand.u32 2147483647, %v4062_v55  ;;  %4071 = vpow2.f32 %v1621_v46 }
 0x936   :  { %vm1686_vm12 = vcmp.lt.f32.partialorder %v1685_v19, 0.0004427343  ;;  %4073 = vpow2.f32 %v1623_v47  ;;  %v3225_v19 = vld [vmem:[%s5074_s24 + $0x108] sm:$0xff]  ;;  %v3910_v47 = vpack.c.bf16 %v3239_v28, %v3237_v45  ;;  %v4154_v28 = vld [vmem:[%s5051_s3] sm:$0xff]  }
 0x937   :  { %v1693_v34 = vmul.f32 %v4062_v55, %v1692_v25  ;;  %vm1695_vm13 = vcmp.lt.f32.partialorder %v1694_v29, 0.0004427343  ;;  %4075 = vpow2.f32 %v1625_v49  ;;  %v3231_v25 = vld [vmem:[%s5074_s24 + $0x138] sm:$0xff]  ;;  %v3912_v49 = vpack.c.bf16 %v3238_v8, %v3236_v48  ;;  %v3245_v8 = vld [vmem:[%s5075_s25 + $0x90] sm:$0xff] }
 0x938   :  { %4077 = vpow2.f32 %v1627_v4 }
 0x93b   :  { %v4064_v1 = vpop.eup %4063 }
 0x93c   :  { %v4066_v3 = vpop.eup %4065  ;;  %v1663_v10 = vmul.f32 0.6931472, %v4064_v1 }
 0x93d   :  { %v4068_v15 = vpop.eup %4067  ;;  %v1672_v41 = vmul.f32 0.6931472, %v4066_v3 }
 0x93e   :  { %v1669_v42 = vsel %vm1668_vm10, %v1666_v13, %v1663_v10  ;;  %v1681_v21 = vmul.f32 0.6931472, %v4068_v15  ;;  %v4070_v22 = vpop.eup %4069 }
 0x93f   :  { %v1697_v18 = vadd.f32 %v1669_v42, %v1641_v16  ;;  %v1678_v20 = vsel %vm1677_vm11, %v1675_v43, %v1672_v41  ;;  %v1690_v5 = vmul.f32 0.6931472, %v4070_v22  ;;  %v4072_v51 = vpop.eup %4071 }
 0x940   :  { %v1698_v26 = vadd.f32 %v1678_v20, %v1642_v23  ;;  %v1687_v30 = vsel %vm1686_vm12, %v1684_v24, %v1681_v21  ;;  %v4074_v52 = vpop.eup %4073  ;;  %v1629_v27 = vadd.f32 1.0, %v4072_v51  ;;  %v3227_v20 = vld [vmem:[%s5074_s24 + $0x118] sm:$0xff]  ;;  %v3224_v21 = vld [vmem:[%s5074_s24 + $0x100] sm:$0xff]  ;;  %v3226_v23 = vld [vmem:[%s5074_s24 + $0x110] sm:$0xff] }
 0x941   :  { %1705 = vrot.lane.b32.xlu1 %v1697_v18, %s4165_s22  ;;  %v1699_v37 = vadd.f32 %v1687_v30, %v1643_v32  ;;  %v1696_v38 = vsel %vm1695_vm13, %v1693_v34, %v1690_v5  ;;  %v1630_v53 = vadd.f32 1.0, %v4074_v52  ;;  %v4076_v6 = vpop.eup %4075  ;;  %v4153_v18 = vld [vmem:[%s5049_s0] sm:$0xff]  ;;  %v3898_v22 = vpack.c.bf16 %v3227_v20, %v3225_v19  ;;  %v3229_v24 = vld [vmem:[%s5074_s24 + $0x128] sm:$0xff]  ;;  %v3230_v5 = vld [vmem:[%s5074_s24 + $0x130] sm:$0xff] }
 0x942   :  { %v1700_v44 = vadd.f32 %v1696_v38, %v1644_v39  ;;  %4079 = vrcp.f32 %v1629_v27  ;;  %v4078_v35 = vpop.eup %4077  ;;  %v1631_v54 = vadd.f32 1.0, %v4076_v6  ;;  %v3902_v29 = vpack.c.bf16 %v3231_v25, %v3229_v24  ;;  %v3228_v30 = vld [vmem:[%s5074_s24 + $0x120] sm:$0xff]  ;;  %v3233_v32 = vld [vmem:[%s5074_s24 + $0x148] sm:$0xff]  ;;  %v3235_v34 = vld [vmem:[%s5074_s24 + $0x158] sm:$0xff] }
 0x943   :  { %4081 = vrcp.f32 %v1630_v53  ;;  %v1632_v55 = vadd.f32 1.0, %v4078_v35  ;;  %v3906_v38 = vpack.c.bf16 %v3235_v34, %v3233_v32  ;;  %v3232_v39 = vld [vmem:[%s5074_s24 + $0x140] sm:$0xff] }
 0x944   :  { %4083 = vrcp.f32 %v1631_v54 }
 0x945   :  { %1707 = vrot.lane.b32.xlu1 %v1698_v26, %s4165_s22  ;;  %4085 = vrcp.f32 %v1632_v55  ;;  %v3900_v26 = vpack.c.bf16 %v3226_v23, %v3224_v21 }
 0x949   :  { %1709 = vrot.lane.b32.xlu1 %v1699_v37, %s4165_s22  ;;  %v3904_v37 = vpack.c.bf16 %v3230_v5, %v3228_v30 }
 0x94c   :  { %v4080_v36 = vpop.eup %4079 }
 0x94d   :  { %1711 = vrot.lane.b32.xlu1 %v1700_v44, %s4165_s22  ;;  %v4082_v7 = vpop.eup %4081  ;;  %v3234_v44 = vld [vmem:[%s5074_s24 + $0x150] sm:$0xff] }
 0x94e   :  { %v4084_v61 = vpop.eup %4083  ;;  %v3908_v46 = vpack.c.bf16 %v3234_v44, %v3232_v39 }
 0x94f   :  { %v4086_v62 = vpop.eup %4085 }
 0x9b3   :  { %v1706_v56 = vpop.permute.xlu1 %1705 }
 0x9b4   :  { %v1717_v57 = vmul.f32 %v4080_v36, %v1706_v56 }
 0x9b7   :  { %v1708_v59 = vpop.permute.xlu1 %1707 }
 0x9b8   :  { %v1718_v63 = vmul.f32 %v4082_v7, %v1708_v59 }
 0x9ba   :  { %v1721_v58 = vpack.c.bf16 %v1718_v63, %v1717_v57  ;;  %v3222_v63 = vld [vmem:[%s5056_s13 + $0x1] ss:$0 sm:$0xff] }
 0x9bb   :  { %v1710_v60 = vpop.permute.xlu1 %1709 }
 0x9bc   :  { %3606 = vmatpush3.bf16.msra.mxu0 %v1721_v58  ;;  %v1719_v2 = vmul.f32 %v4084_v61, %v1710_v60  ;;  %v3223_v61 = vld [vmem:[%s5057_s14 + $0x1] ss:$0 sm:$0xff] }
 0x9bd   :  { %3607 = vmatprep.subr.bf16.mxu0 %v4161_v50 }
 0x9bf   :  { %v1712_v1 = vpop.permute.xlu1 %1711 }
 0x9c0   :  { %v1720_v3 = vmul.f32 %v4086_v62, %v1712_v1 }
 0x9c2   :  { %v1722_v10 = vpack.c.bf16 %v1720_v3, %v1719_v2 }
 0x9c4   :  { %3608 = vmatpush3.bf16.msra.mxu0 %v1722_v10 }
 0x9c5   :  { %3899 = vmatprep.subr.bf16.mxu0 %v3898_v22 }
 0x9c7   :  { %3610 = vmatmul.mubr.msk.bf16.vlgmr.msra.gmra.mrb[20].mxu0 %vm538_vm3, %v4526_v31 }
 0x9c8   :  { %2076 = vmatprep.mubr.f32.mxu0 %v4161_v50  ;;  %3901 = vmatpush1.bf16.msra.mxu0 %v3900_v26 }
 0x9c9   :  { %3903 = vmatprep.subr.bf16.mxu0 %v3902_v29 }
 0x9cc   :  { %3905 = vmatpush1.bf16.msra.mxu0 %v3904_v37 }
 0x9cd   :  { %3907 = vmatprep.subr.bf16.mxu0 %v3906_v38 }
 0x9d0   :  { %3909 = vmatpush1.bf16.msra.mxu0 %v3908_v46  ;;  %v3243_v46 = vld [vmem:[%s5075_s25 + $0x80] sm:$0xff] }
 0x9d1   :  { %3911 = vmatprep.subr.bf16.mxu0 %v3910_v47  ;;  %v3244_v47 = vld [vmem:[%s5075_s25 + $0x88] sm:$0xff] }
 0x9d2   :  { %v3914_v48 = vpack.c.bf16 %v3244_v47, %v3243_v46 }
 0x9d4   :  { %3913 = vmatpush1.bf16.msra.mxu0 %v3912_v49  ;;  %v3246_v49 = vld [vmem:[%s5075_s25 + $0x98] sm:$0xff] }
 0xa9a   :  { %v4719_v13 = vpop.f32.mrb[20].mxu0 }
 0xa9b   :  { %v3611_v15 = vpop.f32.mrb[21].mxu0  ;;  %v1838_v41 = vmul.f32 %v4719_v13, %v4719_v13 }
 0xa9c   :  { %v4721_v16 = vpop.f32.mrb[22].mxu0 }
 0xa9d   :  { %v3893_v42 = vpack.c.bf16 %v4721_v16, %v4719_v13  ;;  %v1839_v43 = vmul.f32 %v4721_v16, %v4721_v16  ;;  %v3612_v17 = vpop.f32.mrb[23].mxu0 }
 0xa9f   :  { %v3896_v9 = vpack.c.bf16 %v1839_v43, %v1838_v41  ;;  %3894 = vmatpush3.bf16.msra.mxu1 %v3893_v42 }
 0xaa0   :  { %3895 = vmatprep.subr.bf16.mxu1 %v4162_v33 }
 0xaa2   :  { %3618 = vmatmul.mubr.msk.f32.vlgmr.msra.gmra.mrb[28].mxu1 %vm411_vm1, %v4164_v0 }
 0xaa3   :  { %3897 = vmatpush3.bf16.msra.mxu1 %v3896_v9  ;;  %3624 = vmatprep.mubr.msk.f32.mxu1 %vm4163_vm2, %v4161_v50 }
 0xaa4   :  { %3915 = vmatprep.subr.bf16.mxu1 %v3914_v48 }
 0xaa6   :  { %3625 = vmatmul.mubr.msk.f32.vlgmr.msra.gmra.mrb[30].mxu1 %vm411_vm1, %v4164_v0 }
 0xaa7   :  { %3643 = vmatprep.mubr.msk.f32.mxu1 %vm203_vm0, %v4153_v18  ;;  %3917 = vmatpush3.bf16.msra.mxu1 %v3914_v48 }
 0xb75   :  { %v1834_v4 = vpop.f32.mrb[28].mxu1 }
 0xb76   :  { %v1910_v51 = vmul.f32 0.0625, %v1834_v4  ;;  %v3619_v52 = vpop.f32.mrb[29].mxu1  ;;  %v3918_v4 = vpack.c.bf16 %v3246_v49, %v3245_v8 }
 0xb77   :  { %v3248_v52 = vld [vmem:[%s5075_s25 + $0xa8] sm:$0xff] }
 0xb78   :  { %v1917_v27 = vrot.slane %v1910_v51, %v4447_v12  ;;  %v1912_v6 = vmul.f32 %v1910_v51, %v1910_v51  ;;  %v3247_v51 = vld [vmem:[%s5075_s25 + $0xa0] sm:$0xff]  ;;  %3919 = vmatprep.subr.bf16.mxu1 %v3918_v4 }
 0xb79   :  { %v1906_v53 = vpop.f32.mrb[30].mxu1  ;;  %3921 = vmatpush3.bf16.msra.mxu1 %v3918_v4 }
 0xb7a   :  { %v1918_v35 = vsub.f32 %v4719_v13, %v1917_v27  ;;  %v1919_v54 = vsub.f32 %v4721_v16, %v1917_v27  ;;  %v1911_v55 = vmul.f32 0.0625, %v1906_v53  ;;  %v3626_v56 = vpop.f32.mrb[31].mxu1  ;;  %v3922_v27 = vpack.c.bf16 %v3248_v52, %v3247_v51  ;;  %v3249_v53 = vld [vmem:[%s5075_s25 + $0xb0] sm:$0xff] }
 0xb7b   :  { %v4157_v56 = vld [vmem:[%s5049_s0 + $0x18] sm:$0xff] }
 0xb7c   :  { %v1913_v36 = vsub.f32 %v1911_v55, %v1912_v6  ;;  %3923 = vmatprep.subr.bf16.mxu1 %v3922_v27  ;;  %v3250_v6 = vld [vmem:[%s5075_s25 + $0xb8] sm:$0xff]  ;;  %v4156_v55 = vld [vmem:[%s5049_s0 + $0x10] sm:$0xff] }
 0xb7d   :  { %3925 = vmatpush3.bf16.msra.mxu1 %v3922_v27 }
 0xb7e   :  { %v1920_v7 = vadd.f32 1e-05, %v1913_v36  ;;  %v3240_v36 = vld [vmem:[%s5052_s8 + $0x4] sm:$0x3] }
 0xb80   :  { %4087 = vrsqrt.f32 %v1920_v7 }
 0xb8a   :  { %v4088_v59 = vpop.eup %4087 }
 0xb8b   :  { %v1925_v57 = vrot.slane %v4088_v59, %v4447_v12  ;;  %v1999_v59 = vrot.slane %v3240_v36, %v4447_v12 }
 0xb8d   :  { %v1926_v58 = vmul.f32 %v1925_v57, %v1918_v35  ;;  %v1927_v60 = vmul.f32 %v1925_v57, %v1919_v54  ;;  %v3926_v35 = vpack.c.bf16 %v3250_v6, %v3249_v53  ;;  %v4155_v54 = vld [vmem:[%s5049_s0 + $0x8] sm:$0xff] }
 0xb8f   :  { %v1934_v62 = vmul.f32 %v3222_v63, %v1926_v58  ;;  %v1935_v1 = vmul.f32 %v3222_v63, %v1927_v60  ;;  %3927 = vmatprep.subr.bf16.mxu1 %v3926_v35  ;;  %v2003_v63 = vrot.slane %v3240_v36, %v4452_v14  ;;  %v4159_v14 = vld [vmem:[%s5050_s2] sm:$0xff]  }
 0xb90   :  { %3929 = vmatpush3.bf16.msra.mxu1 %v3926_v35  ;;  %v3265_v36 = vld [vmem:[%s5054_s11 + $0x2] ss:$0 sm:$0xff] }
 0xb91   :  { %v1942_v2 = vadd.f32 %v3223_v61, %v1934_v62  ;;  %v1943_v3 = vadd.f32 %v3223_v61, %v1935_v1  ;;  %3930 = vmatprep.subr.bf16.mxu1 %v4162_v33 }
 0xb93   :  { %v1944_v10 = vadd.f32 %v1942_v2, %v4610_v11  ;;  %v1945_v13 = vadd.f32 %v1943_v3, %v4615_v40  ;;  %3644 = vmatmul.mubr.msk.f32.vlgmr.msra.gmra.mrb[32].mxu1 %vm203_vm0, %v4155_v54 }
 0xb94   :  { %3646 = vmatprep.mubr.msk.f32.mxu1 %vm203_vm0, %v4156_v55 }
 0xb95   :  { %v1948_v15 = vand.u32 2147483647, %v1944_v10  ;;  %v1949_v16 = vand.u32 2147483647, %v1945_v13  ;;  %v1946_v5 = vmax.f32 %v1944_v10, 0.0  ;;  %v1947_v44 = vmax.f32 %v1945_v13, 0.0 }
 0xb96   :  { %v4158_v13 = vld [vmem:[%s5051_s3 + $0x8] sm:$0xff]  }
 0xb97   :  { %v1950_v41 = vsub.f32 0.0, %v1948_v15  ;;  %v1951_v42 = vsub.f32 0.0, %v1949_v16  ;;  %3647 = vmatmul.mubr.msk.f32.gmra.mrb[34].mxu1 %vm203_vm0, %v4157_v56  ;;  %v4160_v15 = vld [vmem:[%s5050_s2 + $0x8] sm:$0xff]  }
 0xb98   :  { %3669 = vmatprep.mubr.msk.f32.mxu1 %vm4163_vm2, %v4161_v50 }
 0xb99   :  { %v1952_v43 = vmul.f32 1.442695, %v1950_v41  ;;  %v1954_v17 = vmul.f32 1.442695, %v1951_v42 }
 0xb9b   :  { %4089 = vpow2.f32 %v1952_v43 }
 0xb9c   :  { %4091 = vpow2.f32 %v1954_v17  ;;  %v3252_v17 = vld [vmem:[%s5053_s10 + $0x2] ss:$0 sm:$0xff] }
 0xba5   :  { %v4090_v9 = vpop.eup %4089 }
 0xba6   :  { %v4092_v18 = vpop.eup %4091  ;;  %v1956_v19 = vadd.f32 1.0, %v4090_v9  ;;  %v1959_v21 = vmul.f32 -0.5, %v4090_v9  ;;  %v1962_v11 = vand.u32 2147483647, %v4090_v9 }
 0xba7   :  { %v1965_v20 = vadd.f32 1.0, %v4092_v18  ;;  %v1968_v22 = vmul.f32 -0.5, %v4092_v18  ;;  %v1971_v25 = vand.u32 2147483647, %v4092_v18 }
 0xba8   :  { %4093 = vlog2.f32 %v1956_v19  ;;  %v1960_v23 = vadd.f32 1.0, %v1959_v21  ;;  %vm1963_vm14 = vcmp.lt.f32.partialorder %v1962_v11, 0.0004427343 }
 0xba9   :  { %4095 = vlog2.f32 %v1965_v20  ;;  %v1969_v24 = vadd.f32 1.0, %v1968_v22  ;;  %vm1972_vm15 = vcmp.lt.f32.partialorder %v1971_v25, 0.0004427343 }
 0xbaa   :  { %v1961_v30 = vmul.f32 %v4090_v9, %v1960_v23 }
 0xbab   :  { %v1970_v37 = vmul.f32 %v4092_v18, %v1969_v24 }
 0xbb2   :  { %v4094_v40 = vpop.eup %4093 }
 0xbb3   :  { %v4096_v26 = vpop.eup %4095  ;;  %v1958_v29 = vmul.f32 0.6931472, %v4094_v40 }
 0xbb4   :  { %v1967_v32 = vmul.f32 0.6931472, %v4096_v26 }
 0xbb5   :  { %v1964_v34 = vsel %vm1963_vm14, %v1961_v30, %v1958_v29 }
 0xbb6   :  { %v4800_v38 = vadd.f32 %v1964_v34, %v1946_v5  ;;  %v1973_v39 = vsel %vm1972_vm15, %v1970_v37, %v1967_v32 }
 0xbb7   :  { %v4805_v45 = vadd.f32 %v1973_v39, %v1947_v44 }
 0xbb8   :  { %3241 = vmatmul.mubr.msk.f32.vlgmr.msra.gmra.mrb[14].mxu0 %vm203_vm0, %v4800_v38 }
 0xbb9   :  { %2082 = vmatprep.mubr.f32.mxu0 %v4161_v50 }
 0xbbc   :  { %3242 = vmatmul.mubr.msk.f32.gmra.mrb[24].mxu0 %vm203_vm0, %v4805_v45 }
 0xbbd   :  { %3651 = vmatprep.mubr.msk.bf16.mxu0 %vm411_vm1, %v4154_v28 }
 0xc66   :  { %v3645_v16 = vpop.f32.mrb[32].mxu1 }
 0xc67   :  { %v2172_v41 = vpop.f32.mrb[33].mxu1  ;;  %v2178_v20 = vadd.f32 %v3645_v16, %v3252_v17 }
 0xc68   :  { %v2173_v18 = vadd.f32 %v3252_v17, %v2172_v41 }
 0xc6a   :  { %v3648_v42 = vpop.f32.mrb[34].mxu1 }
 0xc6b   :  { %v2182_v43 = vpop.f32.mrb[35].mxu1  ;;  %v2188_v19 = vadd.f32 %v3648_v42, %v3252_v17 }
 0xc6c   :  { %v2183_v9 = vadd.f32 %v3252_v17, %v2182_v43 }
 0xc8b   :  { %v2078_v7 = vpop.f32.mrb[14].mxu0 }
 0xc8c   :  { %v2080_v57 = vpop.f32.mrb[15].mxu0  ;;  %v2079_v60 = vadd.f32 %v2078_v7, %v1999_v59 }
 0xc8d   :  { %v2081_v1 = vadd.f32 %v2080_v57, %v2003_v63 }
 0xc8f   :  { %v2084_v58 = vpop.f32.mrb[24].mxu0 }
 0xc90   :  { %v2085_v61 = vadd.f32 %v2084_v58, %v1999_v59  ;;  %v2086_v62 = vpop.f32.mrb[25].mxu0  ;;  %v3266_v58 = vld [vmem:[%s5055_s12 + $0x2] ss:$0 sm:$0xff] }
 0xc91   :  { %v2087_v2 = vadd.f32 %v2086_v62, %v2003_v63 }
 0xc92   :  { %v2191_v3 = vpack.c.bf16 %v2085_v61, %v2079_v60 }
 0xc93   :  { %v2192_v10 = vpack.c.bf16 %v2087_v2, %v2081_v1 }
 0xc95   :  { %3649 = vmatprep.subr.bf16.mxu0 %v2192_v10 }
 0xc96   :  { %3650 = vmatpush3.bf16.msra.mxu0 %v2192_v10 }
 0xc97   :  { %3655 = vmatprep.subr.bf16.mxu0 %v2191_v3 }
 0xc99   :  { %3652 = vmatmul.mubr.msk.bf16.vlgmr.msra.gmra.mrb[28].mxu0 %vm411_vm1, %v4158_v13 }
 0xc9a   :  { %3656 = vmatpush3.bf16.msra.mxu0 %v2191_v3  ;;  %3657 = vmatprep.mubr.msk.bf16.mxu0 %vm411_vm1, %v4159_v14 }
 0xc9b   :  { %3683 = vmatprep.subr.bf16.mxu0 %v4161_v50 }
 0xca5   :  { %3658 = vmatmul.mubr.msk.bf16.vlgmr.msra.gmra.mrb[28].mxu0 %vm411_vm1, %v4160_v15 }
 0xca6   :  { %3687 = vmatprep.mubr.msk.bf16.mxu0 %vm4163_vm2, %v4161_v50 }
 0xd78   :  { %v3659_v21 = vpop.f32.mrb[28].mxu0 }
 0xd79   :  { %v2293_v22 = vadd.f32 %v3659_v21, %v2183_v9  ;;  %v2276_v23 = vpop.f32.mrb[29].mxu0 }
 0xd7a   :  { %v2291_v11 = vadd.f32 %v2276_v23, %v2173_v18  ;;  %v3660_v24 = vpop.f32.mrb[30].mxu0 }
 0xd7b   :  { %v2294_v40 = vadd.f32 %v3660_v24, %v2188_v19  ;;  %v2279_v25 = vpop.f32.mrb[31].mxu0  ;;  %v2371_v39 = vmul.f32 %v2293_v22, %v2293_v22 }
 0xd7c   :  { %v2292_v26 = vadd.f32 %v2279_v25, %v2178_v20  ;;  %v2369_v32 = vmul.f32 %v2291_v11, %v2291_v11 }
 0xd7d   :  { %v3934_v30 = vpack.c.bf16 %v2294_v40, %v2293_v22  ;;  %v2372_v34 = vmul.f32 %v2294_v40, %v2294_v40 }
 0xd7e   :  { %v3931_v29 = vpack.c.bf16 %v2292_v26, %v2291_v11  ;;  %v2370_v5 = vmul.f32 %v2292_v26, %v2292_v26 }
 0xd7f   :  { %v3940_v44 = vpack.c.bf16 %v2372_v34, %v2371_v39 }
 0xd80   :  { %3932 = vmatpush3.bf16.msra.mxu1 %v3931_v29  ;;  %v3937_v37 = vpack.c.bf16 %v2370_v5, %v2369_v32 }
 0xd81   :  { %3933 = vmatprep.subr.bf16.mxu1 %v4162_v33 }
 0xd84   :  { %3935 = vmatpush3.bf16.msra.mxu1 %v3934_v30 }
 0xd85   :  { %3936 = vmatprep.subr.bf16.mxu1 %v4162_v33 }
 0xd87   :  { %3670 = vmatmul.mubr.msk.f32.vlgmr.msra.gmra.mrb[36].mxu1 %vm538_vm3, %v4164_v0 }
 0xd88   :  { %3938 = vmatpush3.bf16.msra.mxu1 %v3937_v37  ;;  %3680 = vmatprep.mubr.msk.f32.mxu1 %vm4163_vm2, %v4161_v50 }
 0xd89   :  { %3939 = vmatprep.subr.bf16.mxu1 %v4162_v33 }
 0xd8c   :  { %3941 = vmatpush3.bf16.msra.mxu1 %v3940_v44 }
 0xd8d   :  { %3942 = vmatprep.subr.bf16.mxu1 %v4162_v33 }
 0xd8f   :  { %3681 = vmatmul.mubr.msk.f32.vlgmr.msra.gmra.mrb[38].mxu1 %vm538_vm3, %v4164_v0 }
 0xd90   :  { %3695 = vmatprep.mubr.msk.f32.mxu1 %vm4163_vm2, %v4161_v50 }
 0xe5a   :  { %v2365_v28 = vpop.f32.mrb[36].mxu1 }
 0xe5b   :  { %v3671_v46 = vpop.f32.mrb[37].mxu1  ;;  %v2443_v47 = vmul.f32 0.03125, %v2365_v28 }
 0xe5d   :  { %v2445_v8 = vmul.f32 %v2443_v47, %v2443_v47  ;;  %v2450_v27 = vrot.slane %v2443_v47, %v4447_v12 }
 0xe5f   :  { %v2451_v6 = vsub.f32 %v2291_v11, %v2450_v27  ;;  %v2452_v35 = vsub.f32 %v2292_v26, %v2450_v27  ;;  %v2453_v54 = vsub.f32 %v2293_v22, %v2450_v27  ;;  %v2454_v55 = vsub.f32 %v2294_v40, %v2450_v27 }
 0xe62   :  { %v2439_v48 = vpop.f32.mrb[38].mxu1 }
 0xe63   :  { %v2444_v49 = vmul.f32 0.03125, %v2439_v48  ;;  %v3682_v4 = vpop.f32.mrb[39].mxu1 }
 0xe65   :  { %v2446_v51 = vsub.f32 %v2444_v49, %v2445_v8 }
 0xe67   :  { %v2455_v52 = vadd.f32 1e-05, %v2446_v51 }
 0xe69   :  { %4097 = vrsqrt.f32 %v2455_v52 }
 0xe73   :  { %v4098_v53 = vpop.eup %4097 }
 0xe74   :  { %v2460_v56 = vrot.slane %v4098_v53, %v4447_v12 }
 0xe76   :  { %v2461_v7 = vmul.f32 %v2460_v56, %v2451_v6  ;;  %v2462_v59 = vmul.f32 %v2460_v56, %v2452_v35  ;;  %v2463_v57 = vmul.f32 %v2460_v56, %v2453_v54  ;;  %v2464_v63 = vmul.f32 %v2460_v56, %v2454_v55 }
 0xe78   :  { %v2471_v60 = vmul.f32 %v3265_v36, %v2461_v7  ;;  %v2472_v61 = vmul.f32 %v3265_v36, %v2462_v59  ;;  %v2473_v62 = vmul.f32 %v3265_v36, %v2463_v57  ;;  %v2474_v1 = vmul.f32 %v3265_v36, %v2464_v63 }
 0xe7a   :  { %v4895_v2 = vadd.f32 %v3266_v58, %v2471_v60  ;;  %v4897_v3 = vadd.f32 %v3266_v58, %v2472_v61  ;;  %v4899_v10 = vadd.f32 %v3266_v58, %v2473_v62  ;;  %v4901_v13 = vadd.f32 %v3266_v58, %v2474_v1 }
 0xe7c   :  { %v2513_v14 = vand.u32 2147483647, %v4895_v2  ;;  %v2514_v15 = vand.u32 2147483647, %v4897_v3  ;;  %v2515_v41 = vand.u32 2147483647, %v4899_v10 }
 0xe7d   :  { %v2516_v43 = vand.u32 2147483647, %v4901_v13  ;;  %v2509_v49 = vmax.f32 %v4895_v2, 0.0  ;;  %v2510_v36 = vmax.f32 %v4897_v3, 0.0  ;;  %v2511_v61 = vmax.f32 %v4899_v10, 0.0 }
 0xe7e   :  { %v2517_v16 = vsub.f32 0.0, %v2513_v14  ;;  %v2518_v42 = vsub.f32 0.0, %v2514_v15  ;;  %v2519_v9 = vsub.f32 0.0, %v2515_v41  ;;  %v2512_v15 = vmax.f32 %v4901_v13, 0.0 }
 0xe7f   :  { %v2520_v19 = vsub.f32 0.0, %v2516_v43  ;;  %v2485_v41 = vsub.f32 0.0, %v4895_v2 }
 0xe80   :  { %v2521_v17 = vmul.f32 1.442695, %v2517_v16  ;;  %v2523_v18 = vmul.f32 1.442695, %v2518_v42  ;;  %v2525_v20 = vmul.f32 1.442695, %v2519_v9 }
 0xe81   :  { %v2527_v21 = vmul.f32 1.442695, %v2520_v19  ;;  %v2486_v42 = vsub.f32 0.0, %v4897_v3  ;;  %v2489_v43 = vmul.f32 1.442695, %v2485_v41  ;;  %v2487_v9 = vsub.f32 0.0, %v4899_v10 }
 0xe82   :  { %4099 = vpow2.f32 %v2521_v17 }
 0xe83   :  { %4101 = vpow2.f32 %v2523_v18  ;;  %v2491_v17 = vmul.f32 1.442695, %v2486_v42  ;;  %v2488_v18 = vsub.f32 0.0, %v4901_v13  ;;  %v2493_v19 = vmul.f32 1.442695, %v2487_v9 }
 0xe84   :  { %4103 = vpow2.f32 %v2525_v20 }
 0xe85   :  { %4105 = vpow2.f32 %v2527_v21  ;;  %v2495_v20 = vmul.f32 1.442695, %v2488_v18 }
 0xe8c   :  { %v4100_v22 = vpop.eup %4099 }
 0xe8d   :  { %v4102_v23 = vpop.eup %4101  ;;  %v2529_v11 = vadd.f32 1.0, %v4100_v22  ;;  %v2532_v30 = vmul.f32 -0.5, %v4100_v22  ;;  %v2535_v34 = vand.u32 2147483647, %v4100_v22 }
 0xe8e   :  { %v4104_v24 = vpop.eup %4103  ;;  %v2538_v40 = vadd.f32 1.0, %v4102_v23  ;;  %v2541_v5 = vmul.f32 -0.5, %v4102_v23  ;;  %v2544_v28 = vand.u32 2147483647, %v4102_v23 }
 0xe8f   :  { %v4106_v25 = vpop.eup %4105  ;;  %4107 = vlog2.f32 %v2529_v11  ;;  %v2547_v26 = vadd.f32 1.0, %v4104_v24  ;;  %v2533_v32 = vadd.f32 1.0, %v2532_v30  ;;  %v2550_v39 = vmul.f32 -0.5, %v4104_v24 }
 0xe90   :  { %4109 = vlog2.f32 %v2538_v40  ;;  %v2556_v29 = vadd.f32 1.0, %v4106_v25  ;;  %v2542_v37 = vadd.f32 1.0, %v2541_v5  ;;  %vm2536_vm4 = vcmp.lt.f32.partialorder %v2535_v34, 0.0004427343 }
 0xe91   :  { %4111 = vlog2.f32 %v2547_v26  ;;  %v2534_v48 = vmul.f32 %v4100_v22, %v2533_v32  ;;  %v2551_v27 = vadd.f32 1.0, %v2550_v39  ;;  %v2559_v53 = vmul.f32 -0.5, %v4106_v25 }
 0xe92   :  { %4113 = vlog2.f32 %v2556_v29  ;;  %v2543_v52 = vmul.f32 %v4102_v23, %v2542_v37  ;;  %vm2545_vm5 = vcmp.lt.f32.partialorder %v2544_v28, 0.0004427343  ;;  %v2553_v35 = vand.u32 2147483647, %v4104_v24 }
 0xe93   :  { %v2552_v7 = vmul.f32 %v4104_v24, %v2551_v27  ;;  %v2560_v59 = vadd.f32 1.0, %v2559_v53  ;;  %v2562_v63 = vand.u32 2147483647, %v4106_v25  ;;  %4115 = vpow2.f32 %v2489_v43 }
 0xe94   :  { %vm2554_vm6 = vcmp.lt.f32.partialorder %v2553_v35, 0.0004427343  ;;  %4117 = vpow2.f32 %v2491_v17 }
 0xe95   :  { %v2561_v62 = vmul.f32 %v4106_v25, %v2560_v59  ;;  %vm2563_vm7 = vcmp.lt.f32.partialorder %v2562_v63, 0.0004427343  ;;  %4119 = vpow2.f32 %v2493_v19 }
 0xe96   :  { %4121 = vpow2.f32 %v2495_v20 }
 0xe99   :  { %v4108_v44 = vpop.eup %4107 }
 0xe9a   :  { %v4110_v46 = vpop.eup %4109  ;;  %v2531_v47 = vmul.f32 0.6931472, %v4108_v44 }
 0xe9b   :  { %v4112_v8 = vpop.eup %4111  ;;  %v2540_v4 = vmul.f32 0.6931472, %v4110_v46 }
 0xe9c   :  { %v2537_v51 = vsel %vm2536_vm4, %v2534_v48, %v2531_v47  ;;  %v2549_v55 = vmul.f32 0.6931472, %v4112_v8  ;;  %v4114_v56 = vpop.eup %4113 }
 0xe9d   :  { %v2565_v6 = vadd.f32 %v2537_v51, %v2509_v49  ;;  %v2546_v54 = vsel %vm2545_vm5, %v2543_v52, %v2540_v4  ;;  %v2558_v60 = vmul.f32 0.6931472, %v4114_v56  ;;  %v4116_v21 = vpop.eup %4115 }
 0xe9e   :  { %v2566_v57 = vadd.f32 %v2546_v54, %v2510_v36  ;;  %v2555_v58 = vsel %vm2554_vm6, %v2552_v7, %v2549_v55  ;;  %v4118_v22 = vpop.eup %4117  ;;  %v2497_v23 = vadd.f32 1.0, %v4116_v21 }
 0xe9f   :  { %2573 = vrot.lane.b32.xlu1 %v2565_v6, %s4165_s22  ;;  %v2567_v1 = vadd.f32 %v2555_v58, %v2511_v61  ;;  %v2564_v14 = vsel %vm2563_vm7, %v2561_v62, %v2558_v60  ;;  %v2498_v11 = vadd.f32 1.0, %v4118_v22  ;;  %v4120_v2 = vpop.eup %4119  ;;  %v3272_v60 = vld [vmem:[%s5056_s13 + $0x2] ss:$0 sm:$0xff] }
 0xea0   :  { %v2568_v16 = vadd.f32 %v2564_v14, %v2512_v15  ;;  %4123 = vrcp.f32 %v2497_v23  ;;  %v4122_v3 = vpop.eup %4121  ;;  %v2499_v24 = vadd.f32 1.0, %v4120_v2 }
 0xea1   :  { %4125 = vrcp.f32 %v2498_v11  ;;  %v2500_v40 = vadd.f32 1.0, %v4122_v3 }
 0xea2   :  { %4127 = vrcp.f32 %v2499_v24 }
 0xea3   :  { %2575 = vrot.lane.b32.xlu1 %v2566_v57, %s4165_s22  ;;  %4129 = vrcp.f32 %v2500_v40 }
 0xea7   :  { %2577 = vrot.lane.b32.xlu1 %v2567_v1, %s4165_s22  ;;  %v3273_v1 = vld [vmem:[%s5057_s14 + $0x2] ss:$0 sm:$0xff] }
 0xeaa   :  { %v4124_v10 = vpop.eup %4123 }
 0xeab   :  { %2579 = vrot.lane.b32.xlu1 %v2568_v16, %s4165_s22  ;;  %v4126_v13 = vpop.eup %4125 }
 0xeac   :  { %v4128_v34 = vpop.eup %4127 }
 0xead   :  { %v4130_v37 = vpop.eup %4129 }
 0xf11   :  { %v2574_v25 = vpop.permute.xlu1 %2573 }
 0xf12   :  { %v2585_v29 = vmul.f32 %v4124_v10, %v2574_v25 }
 0xf15   :  { %v2576_v26 = vpop.permute.xlu1 %2575 }
 0xf16   :  { %v2586_v30 = vmul.f32 %v4126_v13, %v2576_v26 }
 0xf18   :  { %v2589_v5 = vpack.c.bf16 %v2586_v30, %v2585_v29 }
 0xf19   :  { %v2578_v32 = vpop.permute.xlu1 %2577 }
 0xf1a   :  { %3684 = vmatpush3.bf16.msra.mxu0 %v2589_v5  ;;  %v2587_v44 = vmul.f32 %v4128_v34, %v2578_v32 }
 0xf1b   :  { %3685 = vmatprep.subr.bf16.mxu0 %v4161_v50 }
 0xf1d   :  { %v2580_v39 = vpop.permute.xlu1 %2579 }
 0xf1e   :  { %v2588_v28 = vmul.f32 %v4130_v37, %v2580_v39 }
 0xf20   :  { %v2590_v46 = vpack.c.bf16 %v2588_v28, %v2587_v44 }
 0xf22   :  { %3686 = vmatpush3.bf16.msra.mxu0 %v2590_v46  ;;  %v2844_v46 = vld [vmem:[%s5058_s4] sm:$0x3] }
 0xf23   :  { %3948 = vmatprep.subr.bf16.mxu0 %v4162_v33 }
 0xf25   :  { %3688 = vmatmul.mubr.msk.bf16.vlgmr.msra.gmra.mrb[32].mxu0 %vm538_vm3, %v4526_v31 }
 0xf26   :  { %3709 = vmatprep.mubr.msk.f32.mxu0 %vm4163_vm2, %v4161_v50 }
 0xff8   :  { %v2625_v47 = vpop.f32.mrb[32].mxu0 }
 0xff9   :  { %v3689_v48 = vpop.f32.mrb[33].mxu0  ;;  %v2706_v49 = vmul.f32 %v2625_v47, %v2625_v47 }
 0xffa   :  { %v2628_v8 = vpop.f32.mrb[34].mxu0  ;;  %v2934_v48 = vld [vmem:[%s5059_s15 + $0x8] sm:$0xff] }
 0xffb   :  { %v3943_v4 = vpack.c.bf16 %v2628_v8, %v2625_v47  ;;  %v2707_v51 = vmul.f32 %v2628_v8, %v2628_v8  ;;  %v3690_v52 = vpop.f32.mrb[35].mxu0 }
 0xffc   :  { %v2938_v52 = vld [vmem:[%s5059_s15 + $0x28] sm:$0xff] }
 0xffd   :  { %v3946_v27 = vpack.c.bf16 %v2707_v51, %v2706_v49  ;;  %3944 = vmatpush3.bf16.msra.mxu1 %v3943_v4  ;;  %v2935_v49 = vld [vmem:[%s5059_s15 + $0x10] sm:$0xff]  ;;  %v2937_v51 = vld [vmem:[%s5059_s15 + $0x20] sm:$0xff] }
 0xffe   :  { %3945 = vmatprep.subr.bf16.mxu1 %v4162_v33 }
0x1000   :  { %3696 = vmatmul.mubr.msk.f32.vlgmr.msra.gmra.mrb[40].mxu1 %vm411_vm1, %v4164_v0 }
0x1001   :  { %3947 = vmatpush3.bf16.msra.mxu1 %v3946_v27  ;;  %3702 = vmatprep.mubr.msk.f32.mxu1 %vm4163_vm2, %v4161_v50  ;;  %v3958_v27 = vpack.c.bf16 %v2938_v52, %v2937_v51 }
0x1002   :  { %3951 = vmatprep.subr.bf16.mxu1 %v4162_v33 }
0x1004   :  { %3703 = vmatmul.mubr.msk.f32.vlgmr.msra.gmra.mrb[42].mxu1 %vm411_vm1, %v4164_v0 }
0x1005   :  { %3728 = vmatprep.mubr.msk.f32.mxu1 %vm4163_vm2, %v4161_v50 }
0x10d3   :  { %v2702_v31 = vpop.f32.mrb[40].mxu1 }
0x10d4   :  { %v2778_v53 = vmul.f32 0.0625, %v2702_v31  ;;  %v3697_v6 = vpop.f32.mrb[41].mxu1  ;;  %v2939_v31 = vld [vmem:[%s5059_s15 + $0x30] sm:$0xff] }
0x10d6   :  { %v2785_v35 = vrot.slane %v2778_v53, %v4447_v12  ;;  %v2780_v55 = vmul.f32 %v2778_v53, %v2778_v53  ;;  %v2940_v53 = vld [vmem:[%s5059_s15 + $0x38] sm:$0xff] }
0x10d7   :  { %v2774_v54 = vpop.f32.mrb[42].mxu1  ;;  %v3961_v6 = vpack.c.bf16 %v2940_v53, %v2939_v31 }
0x10d8   :  { %v2786_v56 = vsub.f32 %v2625_v47, %v2785_v35  ;;  %v2787_v36 = vsub.f32 %v2628_v8, %v2785_v35  ;;  %v2779_v7 = vmul.f32 0.0625, %v2774_v54  ;;  %v3704_v59 = vpop.f32.mrb[43].mxu1  ;;  %v2933_v47 = vld [vmem:[%s5059_s15] sm:$0xff] }
0x10d9   :  { %v3952_v8 = vpack.c.bf16 %v2934_v48, %v2933_v47 }
0x10da   :  { %v2781_v57 = vsub.f32 %v2779_v7, %v2780_v55 }
0x10db   :  { %3953 = vmatpush3.bf16.msra.mxu1 %v3952_v8 }
0x10dc   :  { %v2788_v63 = vadd.f32 1e-05, %v2781_v57  ;;  %3954 = vmatprep.subr.bf16.mxu1 %v4162_v33 }
0x10de   :  { %4131 = vrsqrt.f32 %v2788_v63 }
0x10e8   :  { %v4132_v58 = vpop.eup %4131 }
0x10e9   :  { %v2793_v0 = vrot.slane %v4132_v58, %v4447_v12 }
0x10eb   :  { %v2794_v61 = vmul.f32 %v2793_v0, %v2786_v56  ;;  %v2795_v62 = vmul.f32 %v2793_v0, %v2787_v36 }
0x10ed   :  { %v2802_v14 = vmul.f32 %v3272_v60, %v2794_v61  ;;  %v2803_v15 = vmul.f32 %v3272_v60, %v2795_v62 }
0x10ef   :  { %v2810_v16 = vadd.f32 %v3273_v1, %v2802_v14  ;;  %v2811_v41 = vadd.f32 %v3273_v1, %v2803_v15  ;;  %v3051_v15 = vld [vmem:[%s5060_s17] sm:$0xff] }
0x10f1   :  { %v2812_v42 = vadd.f32 %v2810_v16, %v4800_v38  ;;  %v2813_v43 = vadd.f32 %v2811_v41, %v4805_v45  ;;  %v3052_v16 = vld [vmem:[%s5060_s17 + $0x8] sm:$0xff]  ;;  %v3053_v41 = vld [vmem:[%s5060_s17 + $0x10] sm:$0xff] }
0x10f3   :  { %v2816_v17 = vand.u32 2147483647, %v2812_v42  ;;  %v2817_v12 = vand.u32 2147483647, %v2813_v43  ;;  %v2814_v29 = vmax.f32 %v2812_v42, 0.0  ;;  %v2815_v32 = vmax.f32 %v2813_v43, 0.0 }
0x10f4   :  { %v3964_v42 = vpack.c.bf16 %v3052_v16, %v3051_v15  ;;  %v3054_v43 = vld [vmem:[%s5060_s17 + $0x18] sm:$0xff] }
0x10f5   :  { %v2818_v9 = vsub.f32 0.0, %v2816_v17  ;;  %v2819_v18 = vsub.f32 0.0, %v2817_v12  ;;  %v3967_v17 = vpack.c.bf16 %v3054_v43, %v3053_v41  ;;  %v3055_v12 = vld [vmem:[%s5060_s17 + $0x20] sm:$0xff] }
0x10f7   :  { %v2820_v19 = vmul.f32 1.442695, %v2818_v9  ;;  %v2822_v20 = vmul.f32 1.442695, %v2819_v18  ;;  %v3056_v9 = vld [vmem:[%s5060_s17 + $0x28] sm:$0xff] }
0x10f8   :  { %v3970_v18 = vpack.c.bf16 %v3056_v9, %v3055_v12 }
0x10f9   :  { %4133 = vpow2.f32 %v2820_v19  ;;  %v3057_v19 = vld [vmem:[%s5060_s17 + $0x30] sm:$0xff] }
0x10fa   :  { %4135 = vpow2.f32 %v2822_v20  ;;  %v3058_v20 = vld [vmem:[%s5060_s17 + $0x38] sm:$0xff] }
0x1103   :  { %v4134_v21 = vpop.eup %4133 }
0x1104   :  { %v4136_v22 = vpop.eup %4135  ;;  %v2824_v23 = vadd.f32 1.0, %v4134_v21  ;;  %v2827_v2 = vmul.f32 -0.5, %v4134_v21  ;;  %v2830_v38 = vand.u32 2147483647, %v4134_v21 }
0x1105   :  { %v2833_v11 = vadd.f32 1.0, %v4136_v22  ;;  %v2836_v3 = vmul.f32 -0.5, %v4136_v22  ;;  %v2839_v45 = vand.u32 2147483647, %v4136_v22 }
0x1106   :  { %4137 = vlog2.f32 %v2824_v23  ;;  %v2828_v24 = vadd.f32 1.0, %v2827_v2  ;;  %vm2831_vm3 = vcmp.lt.f32.partialorder %v2830_v38, 0.0004427343  ;;  %v3060_v23 = vld [vmem:[%s5060_s17 + $0x48] sm:$0xff]  ;;  %v3061_v2 = vld [vmem:[%s5060_s17 + $0x50] sm:$0xff]  ;;  %v3063_v38 = vld [vmem:[%s5060_s17 + $0x60] sm:$0xff] }
0x1107   :  { %4139 = vlog2.f32 %v2833_v11  ;;  %v2837_v40 = vadd.f32 1.0, %v2836_v3  ;;  %vm2840_vm8 = vcmp.lt.f32.partialorder %v2839_v45, 0.0004427343  ;;  %v3062_v3 = vld [vmem:[%s5060_s17 + $0x58] sm:$0xff] }
0x1108   :  { %v2829_v26 = vmul.f32 %v4134_v21, %v2828_v24  ;;  %v3973_v21 = vpack.c.bf16 %v3058_v20, %v3057_v19  ;;  %v3979_v24 = vpack.c.bf16 %v3062_v3, %v3061_v2 }
0x1109   :  { %v2838_v5 = vmul.f32 %v4136_v22, %v2837_v40  ;;  %v3059_v22 = vld [vmem:[%s5060_s17 + $0x40] sm:$0xff]  ;;  %v3064_v40 = vld [vmem:[%s5060_s17 + $0x68] sm:$0xff] }
0x110a   :  { %v3976_v11 = vpack.c.bf16 %v3060_v23, %v3059_v22  ;;  %v3982_v45 = vpack.c.bf16 %v3064_v40, %v3063_v38 }
0x1110   :  { %v4138_v25 = vpop.eup %4137 }
0x1111   :  { %v4140_v10 = vpop.eup %4139  ;;  %v2826_v13 = vmul.f32 0.6931472, %v4138_v25  ;;  %v3065_v25 = vld [vmem:[%s5060_s17 + $0x70] sm:$0xff] }
0x1112   :  { %v2835_v30 = vmul.f32 0.6931472, %v4140_v10  ;;  %v3066_v10 = vld [vmem:[%s5060_s17 + $0x78] sm:$0xff] }
0x1113   :  { %v2832_v34 = vsel %vm2831_vm3, %v2829_v26, %v2826_v13  ;;  %v3985_v13 = vpack.c.bf16 %v3066_v10, %v3065_v25  ;;  %v3275_v26 = vld [vmem:[%s5061_s16] ss:$0 sm:$0xff] }
0x1114   :  { %v2841_v37 = vsel %vm2840_vm8, %v2838_v5, %v2835_v30  ;;  %v2842_v39 = vadd.f32 %v2832_v34, %v2814_v29 }
0x1115   :  { %v2843_v44 = vadd.f32 %v2841_v37, %v2815_v32 }
0x1117   :  { %v3949_v28 = vpack.c.bf16 %v2843_v44, %v2842_v39 }
0x1119   :  { %3950 = vmatpush3.bf16.msra.mxu0 %v3949_v28 }
0x111a   :  { %3963 = vmatprep.subr.bf16.mxu0 %v4162_v33 }
0x111c   :  { %3710 = vmatmul.mubr.msk.f32.vlgmr.msra.gmra.mrb[26].mxu0 %vm411_vm1, %v2844_v46 }
0x111d   :  { %3763 = vmatprep.mubr.msk.f32.mxu0 %vm4163_vm2, %v4161_v50  ;;  %v2936_v50 = vld [vmem:[%s5059_s15 + $0x18] sm:$0xff]  ;;  %3965 = vmatpush3.bf16.msra.mxu0 %v3964_v42 }
0x111e   :  { %v3955_v4 = vpack.c.bf16 %v2936_v50, %v2935_v49  ;;  %3966 = vmatprep.subr.bf16.mxu0 %v4162_v33 }
0x1120   :  { %3956 = vmatpush3.bf16.msra.mxu1 %v3955_v4 }
0x1121   :  { %3957 = vmatprep.subr.bf16.mxu1 %v4162_v33  ;;  %3968 = vmatpush3.bf16.msra.mxu0 %v3967_v17 }
0x1122   :  { %3969 = vmatprep.subr.bf16.mxu0 %v4162_v33 }
0x1124   :  { %3959 = vmatpush3.bf16.msra.mxu1 %v3958_v27 }
0x1125   :  { %3960 = vmatprep.subr.bf16.mxu1 %v4162_v33  ;;  %3971 = vmatpush3.bf16.msra.mxu0 %v3970_v18 }
0x1126   :  { %3972 = vmatprep.subr.bf16.mxu0 %v4162_v33 }
0x1128   :  { %3962 = vmatpush3.bf16.msra.mxu1 %v3961_v6 }
0x1129   :  { %3974 = vmatpush3.bf16.msra.mxu0 %v3973_v21 }
0x112a   :  { %3975 = vmatprep.subr.bf16.mxu0 %v4162_v33 }
0x112d   :  { %3977 = vmatpush3.bf16.msra.mxu0 %v3976_v11 }
0x112e   :  { %3978 = vmatprep.subr.bf16.mxu0 %v4162_v33 }
0x1131   :  { %3980 = vmatpush3.bf16.msra.mxu0 %v3979_v24 }
0x1132   :  { %3981 = vmatprep.subr.bf16.mxu0 %v4162_v33 }
0x1135   :  { %3983 = vmatpush3.bf16.msra.mxu0 %v3982_v45 }
0x1136   :  { %3984 = vmatprep.subr.bf16.mxu0 %v4162_v33 }
0x1139   :  { %3986 = vmatpush3.bf16.msra.mxu0 %v3985_v13 }
0x11ef   :  { %v2914_v35 = vpop.f32.mrb[26].mxu0 }
0x11f0   :  { %v2919_v54 = vand.u32 2147483647, %v2914_v35  ;;  %v3711_v55 = vpop.f32.mrb[27].mxu0  ;;  %v2918_v62 = vmax.f32 %v2914_v35, 0.0 }
0x11f2   :  { %v2920_v56 = vsub.f32 0.0, %v2919_v54 }
0x11f4   :  { %v2921_v36 = vmul.f32 1.442695, %v2920_v56 }
0x11f6   :  { %4141 = vpow2.f32 %v2921_v36 }
0x1200   :  { %v4142_v7 = vpop.eup %4141 }
0x1201   :  { %v2923_v59 = vadd.f32 1.0, %v4142_v7  ;;  %v2926_v57 = vmul.f32 -0.5, %v4142_v7  ;;  %v2929_v58 = vand.u32 2147483647, %v4142_v7 }
0x1203   :  { %4143 = vlog2.f32 %v2923_v59  ;;  %v2927_v63 = vadd.f32 1.0, %v2926_v57  ;;  %vm2930_vm1 = vcmp.lt.f32.partialorder %v2929_v58, 0.0004427343 }
0x1205   :  { %v2928_v61 = vmul.f32 %v4142_v7, %v2927_v63  ;;  %v3277_v63 = vld [vmem:[%s5062_s18] ss:$0 sm:$0xff] }
0x120d   :  { %v4144_v0 = vpop.eup %4143 }
0x120e   :  { %v2925_v60 = vmul.f32 0.6931472, %v4144_v0 }
0x1210   :  { %v2931_v1 = vsel %vm2930_vm1, %v2928_v61, %v2925_v60 }
0x1211   :  { %v2932_v14 = vadd.f32 %v2931_v1, %v2918_v62 }
0x1213   :  { %3729 = vmatmul.mubr.msk.f32.vlgmr.msra.gmra.mrb[44].mxu1 %vm203_vm0, %v2932_v14 }
0x12e6   :  { %v3017_v29 = vpop.f32.mrb[44].mxu1 }
0x12e7   :  { %v3018_v30 = vadd.f32 %v3275_v26, %v3017_v29  ;;  %v3730_v5 = vpop.f32.mrb[45].mxu1 }
0x12e9   :  { %v3022_v32 = vand.u32 2147483647, %v3018_v30  ;;  %v3021_v49 = vmax.f32 %v3018_v30, 0.0 }
0x12eb   :  { %v3023_v34 = vsub.f32 0.0, %v3022_v32 }
0x12ed   :  { %v3024_v37 = vmul.f32 1.442695, %v3023_v34 }
0x12ef   :  { %4145 = vpow2.f32 %v3024_v37 }
0x12f9   :  { %v4146_v39 = vpop.eup %4145 }
0x12fa   :  { %v3026_v44 = vadd.f32 1.0, %v4146_v39  ;;  %v3029_v28 = vmul.f32 -0.5, %v4146_v39  ;;  %v3032_v47 = vand.u32 2147483647, %v4146_v39 }
0x12fc   :  { %4147 = vlog2.f32 %v3026_v44  ;;  %v3030_v46 = vadd.f32 1.0, %v3029_v28  ;;  %vm3033_vm0 = vcmp.lt.f32.partialorder %v3032_v47, 0.0004427343 }
0x12fe   :  { %v3031_v8 = vmul.f32 %v4146_v39, %v3030_v46 }
0x1306   :  { %v4148_v48 = vpop.eup %4147 }
0x1307   :  { %v3028_v33 = vmul.f32 0.6931472, %v4148_v48 }
0x1309   :  { %v3034_v50 = vsel %vm3033_vm0, %v3031_v8, %v3028_v33 }
0x130a   :  { %v3035_v4 = vadd.f32 %v3034_v50, %v3021_v49 }
0x130c   :  { %v3037_v51 = vand.u32 2147483647, %v3035_v4  ;;  %v3036_v7 = vmax.f32 %v3035_v4, 0.0 }
0x130e   :  { %v3038_v52 = vsub.f32 0.0, %v3037_v51 }
0x1310   :  { %v3039_v27 = vmul.f32 1.442695, %v3038_v52 }
0x1312   :  { %4149 = vpow2.f32 %v3039_v27 }
0x131c   :  { %v4150_v31 = vpop.eup %4149 }
0x131d   :  { %v3041_v53 = vadd.f32 1.0, %v4150_v31  ;;  %v3044_v6 = vmul.f32 -0.5, %v4150_v31  ;;  %v3047_v54 = vand.u32 2147483647, %v4150_v31 }
0x131f   :  { %4151 = vlog2.f32 %v3041_v53  ;;  %v3045_v35 = vadd.f32 1.0, %v3044_v6  ;;  %vm3048_vm2 = vcmp.lt.f32.partialorder %v3047_v54, 0.0004427343 }
0x1321   :  { %v3046_v36 = vmul.f32 %v4150_v31, %v3045_v35 }
0x1329   :  { %v4152_v55 = vpop.eup %4151 }
0x132a   :  { %v3043_v56 = vmul.f32 0.6931472, %v4152_v55 }
0x132c   :  { %v3049_v59 = vsel %vm3048_vm2, %v3046_v36, %v3043_v56 }
0x132d   :  { %v3050_v57 = vadd.f32 %v3049_v59, %v3036_v7 }
0x132f   :  { %3764 = vmatmul.mubr.f32.vlgmr.msra.gmra.mrb[36].mxu0 %v3050_v57 }
0x1402   :  { %v3140_v58 = vpop.f32.mrb[36].mxu0 }
0x1403   :  { %v3141_v0 = vadd.f32 %v3277_v63, %v3140_v58  ;;  %v3765_v60 = vpop.f32.mrb[37].mxu0 }
0x1405   :  { %3144 = vst [vmem:[%s5063_s19] sm:$0x3] %v3141_v0 }

</bundles_post_ra>
